<compile_context>
chip_gen: v7x
topology: tpu7x:2x2x1
jax: 0.10.0
libtpu: 0.0.40
codegen_flags: <defaults>
</compile_context>

<pallas_src>
import functools

import jax
import jax.numpy as jnp
from jax.experimental import pallas as pl
from jax.experimental.pallas import tpu as pltpu


# ------------------------------ Pallas kernel ------------------------------ #

def _resgcn_kernel(x_ref, adj_ref, w1_ref, w2_ref, o_ref, *, negative_slope):
    """Fully fused ResGCN block for a block of BB batch elements.

    x_ref:   (BB, N, F)   node features (residual path, kept f32)
    adj_ref: (BB, N, N)   adjacency (any float dtype; cast to bf16 for MXU)
    w1_ref:  (F, F)       graph_conv1 weight
    w2_ref:  (F, F)       graph_conv2 weight
    o_ref:   (BB, N, F)   x + adj @ leaky_relu(adj @ (x @ W1)) @ W2
    """
    BB, N, F = x_ref.shape

    x = x_ref[...]
    x_f32 = x.astype(jnp.float32)                      # residual path (exact)
    x_bf = x.astype(jnp.bfloat16)                      # MXU operand
    adj = adj_ref[...].astype(jnp.bfloat16)            # (BB, N, N) MXU operand
    w1 = w1_ref[...].astype(jnp.bfloat16)
    w2 = w2_ref[...].astype(jnp.bfloat16)

    # graph_conv1: support = x @ W1 as one big (BB*N, F) x (F, F) contraction.
    s1 = jnp.dot(
        x_bf.reshape(BB * N, F), w1, preferred_element_type=jnp.float32,
    ).reshape(BB, N, F)
    # out1 = adj @ support (batched over BB independent chains).
    h = jnp.einsum(
        "bnm,bmf->bnf", adj, s1.astype(jnp.bfloat16),
        preferred_element_type=jnp.float32,
    )

    # LeakyReLU(0.2) in f32 on the VPU: max(h, slope*h) (slope in [0, 1]).
    h = jnp.maximum(h, negative_slope * h)

    # graph_conv2.
    s2 = jnp.dot(
        h.astype(jnp.bfloat16).reshape(BB * N, F), w2,
        preferred_element_type=jnp.float32,
    ).reshape(BB, N, F)
    g = jnp.einsum(
        "bnm,bmf->bnf", adj, s2.astype(jnp.bfloat16),
        preferred_element_type=jnp.float32,
    )

    # Residual add in f32, single lane-dense store.
    o_ref[...] = (x_f32 + g).astype(o_ref.dtype)


def resgcn_forward(x, adj, w1, w2, *, negative_slope=0.2, block_b=4):
    """x: (B, N, F); adj: (B, N, N); w1, w2: (F, F). Returns [x + res, adj].

    `adj` may be bf16 (recommended: it is MXU-only input, halves HBM bytes).
    Output dtype follows x.
    """
    B, N, F = x.shape
    assert adj.shape == (B, N, N)
    assert w1.shape == (F, F) and w2.shape == (F, F)

    BB = min(block_b, B)
    B_pad = ((B + BB - 1) // BB) * BB
    x_in, adj_in = x, adj
    if B_pad != B:
        pad = B_pad - B
        x_in = jnp.pad(x, ((0, pad), (0, 0), (0, 0)))
        adj_in = jnp.pad(adj, ((0, pad), (0, 0), (0, 0)))

    kernel = functools.partial(_resgcn_kernel, negative_slope=negative_slope)

    out = pl.pallas_call(
        kernel,
        out_shape=jax.ShapeDtypeStruct((B_pad, N, F), x.dtype),
        grid=(B_pad // BB,),
        in_specs=[
            pl.BlockSpec((BB, N, F), lambda b: (b, 0, 0)),   # x
            pl.BlockSpec((BB, N, N), lambda b: (b, 0, 0)),   # adj
            pl.BlockSpec((F, F), lambda b: (0, 0)),          # W1 (resident)
            pl.BlockSpec((F, F), lambda b: (0, 0)),          # W2 (resident)
        ],
        out_specs=pl.BlockSpec((BB, N, F), lambda b: (b, 0, 0)),
        compiler_params=pltpu.CompilerParams(
            dimension_semantics=("parallel",),
        ),
    )(x_in, adj_in, w1, w2)

    if B_pad != B:
        out = out[:B]
    return [out, adj]


# ---------------------------- pure-JAX reference ---------------------------- #

def ref_resgcn_forward(x, adj, w1, w2, *, negative_slope=0.2):
    hp = jax.lax.Precision.HIGHEST
    x = x.astype(jnp.float32)
    adj = adj.astype(jnp.float32)
    s1 = jnp.matmul(x, w1, precision=hp)
    h = jnp.matmul(adj, s1, precision=hp)
    h = jnp.where(h >= 0.0, h, negative_slope * h)
    s2 = jnp.matmul(h, w2, precision=hp)
    g = jnp.matmul(adj, s2, precision=hp)
    return [x + g, adj]


# ----------------------------------- main ----------------------------------- #

if __name__ == "__main__":
    key = jax.random.PRNGKey(0)
    kx, ka, kw1, kw2 = jax.random.split(key, 4)

    # batch=8 with BB=4 -> grid=(2,): both v7x TensorCores get one step each.
    B, N, F = 8, 128, 128

    x = jax.random.normal(kx, (B, N, F), jnp.float32)
    # Row-scaled random adjacency so activations stay O(1); streamed as bf16
    # (MXU-only input) to cut HBM traffic.
    adj = (jax.random.uniform(ka, (B, N, N), jnp.float32) / float(N)).astype(
        jnp.bfloat16)
    # The PyTorch module initializes weights to zeros (forward would be
    # identity + 0); use small random weights so the correctness check is
    # meaningful while keeping forward semantics identical.
    bound = 1.0 / float(F) ** 0.5
    w1 = jax.random.uniform(kw1, (F, F), jnp.float32, -bound, bound)
    w2 = jax.random.uniform(kw2, (F, F), jnp.float32, -bound, bound)

    out, adj_out = resgcn_forward(x, adj, w1, w2)
    out = jax.block_until_ready(out)

    assert out.shape == (B, N, F)
    assert adj_out.shape == (B, N, N)

    ref_out, _ = ref_resgcn_forward(x, adj, w1, w2)
    # bf16 MXU operands -> loosened tolerance vs the f32 HIGHEST reference.
    assert jnp.allclose(out, ref_out, atol=2e-2, rtol=2e-2), "mismatch vs reference"
    assert jnp.array_equal(adj_out, adj), "adjacency must pass through unchanged"

    print("KERNEL_OK")
</pallas_src>

<mosaic_0001>
module attributes {stable_mosaic.version = 11 : i64} {
  func.func @_resgcn_kernel(%arg0: i32, %arg1: memref<4x128x128xf32, #tpu.memory_space<vmem>>, %arg2: memref<4x128x128xbf16, #tpu.memory_space<vmem>>, %arg3: memref<128x128xf32, #tpu.memory_space<vmem>>, %arg4: memref<128x128xf32, #tpu.memory_space<vmem>>, %arg5: memref<4x128x128xf32, #tpu.memory_space<vmem>>) attributes {dimension_semantics = [#tpu.dimension_semantics<parallel>], iteration_bounds = array<i64: 2>, scalar_prefetch = 0 : i64, scratch_operands = 0 : i64, tpu.core_type = #tpu.core_type<tc>, window_params = [{transform_indices = @transform_0, window_bounds = array<i64: 4, 128, 128>}, {transform_indices = @transform_1, window_bounds = array<i64: 4, 128, 128>}, {pipeline_mode = #tpu.pipeline_mode<synchronous>, transform_indices = @transform_2, window_bounds = array<i64: 128, 128>}, {pipeline_mode = #tpu.pipeline_mode<synchronous>, transform_indices = @transform_3, window_bounds = array<i64: 128, 128>}, {transform_indices = @transform_4, window_bounds = array<i64: 4, 128, 128>}]} {
    %c0 = arith.constant 0 : index
    %c0_0 = arith.constant 0 : index
    %c0_1 = arith.constant 0 : index
    %0 = vector.load %arg1[%c0, %c0_0, %c0_1] : memref<4x128x128xf32, #tpu.memory_space<vmem>>, vector<4x128x128xf32>
    %1 = arith.truncf %0 : vector<4x128x128xf32> to vector<4x128x128xbf16>
    %c0_2 = arith.constant 0 : index
    %c0_3 = arith.constant 0 : index
    %c0_4 = arith.constant 0 : index
    %2 = vector.load %arg2[%c0_2, %c0_3, %c0_4] : memref<4x128x128xbf16, #tpu.memory_space<vmem>>, vector<4x128x128xbf16>
    %c0_5 = arith.constant 0 : index
    %c0_6 = arith.constant 0 : index
    %3 = vector.load %arg3[%c0_5, %c0_6] : memref<128x128xf32, #tpu.memory_space<vmem>>, vector<128x128xf32>
    %4 = arith.truncf %3 : vector<128x128xf32> to vector<128x128xbf16>
    %c0_7 = arith.constant 0 : index
    %c0_8 = arith.constant 0 : index
    %5 = vector.load %arg4[%c0_7, %c0_8] : memref<128x128xf32, #tpu.memory_space<vmem>>, vector<128x128xf32>
    %6 = arith.truncf %5 : vector<128x128xf32> to vector<128x128xbf16>
    %7 = vector.shape_cast %1 : vector<4x128x128xbf16> to vector<512x128xbf16>
    %cst = arith.constant dense<0.000000e+00> : vector<512x128xf32>
    %8 = tpu.matmul %7, %4, %cst {dimension_numbers = #tpu.dot_dimension_numbers<[1], [0], [0], [1], [0, 0, 1, 1], [], []>} : vector<512x128xbf16>, vector<128x128xbf16>, vector<512x128xf32> -> vector<512x128xf32>
    %9 = vector.shape_cast %8 : vector<512x128xf32> to vector<4x128x128xf32>
    %10 = arith.truncf %9 : vector<4x128x128xf32> to vector<4x128x128xbf16>
    "tpu.trace_start"() <{level = 10 : i32, message = "bnm,bmf->bnf"}> : () -> ()
    %cst_9 = arith.constant dense<0.000000e+00> : vector<4x128x128xf32>
    %11 = tpu.matmul %2, %10, %cst_9 {dimension_numbers = #tpu.dot_dimension_numbers<[2], [1], [1], [2], [0, 0, 0, 1, 1, 2], [0], [0]>} : vector<4x128x128xbf16>, vector<4x128x128xbf16>, vector<4x128x128xf32> -> vector<4x128x128xf32>
    "tpu.trace_stop"() : () -> ()
    %cst_10 = arith.constant 2.000000e-01 : f32
    %12 = vector.broadcast %cst_10 : f32 to vector<4x128x128xf32>
    %13 = arith.mulf %12, %11 : vector<4x128x128xf32>
    %14 = arith.maximumf %11, %13 : vector<4x128x128xf32>
    %15 = arith.truncf %14 : vector<4x128x128xf32> to vector<4x128x128xbf16>
    %16 = vector.shape_cast %15 : vector<4x128x128xbf16> to vector<512x128xbf16>
    %cst_11 = arith.constant dense<0.000000e+00> : vector<512x128xf32>
    %17 = tpu.matmul %16, %6, %cst_11 {dimension_numbers = #tpu.dot_dimension_numbers<[1], [0], [0], [1], [0, 0, 1, 1], [], []>} : vector<512x128xbf16>, vector<128x128xbf16>, vector<512x128xf32> -> vector<512x128xf32>
    %18 = vector.shape_cast %17 : vector<512x128xf32> to vector<4x128x128xf32>
    %19 = arith.truncf %18 : vector<4x128x128xf32> to vector<4x128x128xbf16>
    "tpu.trace_start"() <{level = 10 : i32, message = "bnm,bmf->bnf"}> : () -> ()
    %cst_12 = arith.constant dense<0.000000e+00> : vector<4x128x128xf32>
    %20 = tpu.matmul %2, %19, %cst_12 {dimension_numbers = #tpu.dot_dimension_numbers<[2], [1], [1], [2], [0, 0, 0, 1, 1, 2], [0], [0]>} : vector<4x128x128xbf16>, vector<4x128x128xbf16>, vector<4x128x128xf32> -> vector<4x128x128xf32>
    "tpu.trace_stop"() : () -> ()
    %21 = arith.addf %0, %20 : vector<4x128x128xf32>
    %c0_13 = arith.constant 0 : index
    %c0_14 = arith.constant 0 : index
    %c0_15 = arith.constant 0 : index
    %22 = vector.load %arg5[%c0_13, %c0_14, %c0_15] : memref<4x128x128xf32, #tpu.memory_space<vmem>>, vector<4x128x128xf32>
    tpu.vector_store %arg5[%c0_13, %c0_14, %c0_15], %21 {strides = array<i32>} : memref<4x128x128xf32, #tpu.memory_space<vmem>>, vector<4x128x128xf32>,
    return
  }
  func.func @transform_0(%arg0: i32) -> (i32, i32, i32) {
    %c0_i32 = arith.constant 0 : i32
    %c0_i32_0 = arith.constant 0 : i32
    %c0_i32_1 = arith.constant 0 : i32
    return %arg0, %c0_i32, %c0_i32_0 : i32, i32, i32
  }
  func.func @transform_1(%arg0: i32) -> (i32, i32, i32) {
    %c0_i32 = arith.constant 0 : i32
    %c0_i32_0 = arith.constant 0 : i32
    %c0_i32_1 = arith.constant 0 : i32
    return %arg0, %c0_i32, %c0_i32_0 : i32, i32, i32
  }
  func.func @transform_2(%arg0: i32) -> (i32, i32) {
    %c0_i32 = arith.constant 0 : i32
    %c0_i32_0 = arith.constant 0 : i32
    %c0_i32_1 = arith.constant 0 : i32
    return %c0_i32, %c0_i32_0 : i32, i32
  }
  func.func @transform_3(%arg0: i32) -> (i32, i32) {
    %c0_i32 = arith.constant 0 : i32
    %c0_i32_0 = arith.constant 0 : i32
    %c0_i32_1 = arith.constant 0 : i32
    return %c0_i32, %c0_i32_0 : i32, i32
  }
  func.func @transform_4(%arg0: i32) -> (i32, i32, i32) {
    %c0_i32 = arith.constant 0 : i32
    %c0_i32_0 = arith.constant 0 : i32
    %c0_i32_1 = arith.constant 0 : i32
    return %arg0, %c0_i32, %c0_i32_0 : i32, i32, i32
  }
}

</mosaic_0001>

<bundles_post_ra>
// kernel: tpu_custom_call.1
= control target key start
LH: loop header
LB: loop body
LE: loop exit
PB: predicated region body
PF: predicated region fallthrough
CT: control target
= control target key end

     0   :  { %s4279_s0 = inlined_call_operand.hbm [shape: f32[8,128,128], index: 0, kind: input, shape index: {}]   ;;  %s4280_s1 = inlined_call_operand.hbm [shape: bf16[8,128,128], index: 1, kind: input, shape index: {}]   ;;  %s4281_s2 = inlined_call_operand.hbm [shape: f32[128,128], index: 2, kind: input, shape index: {}]   ;;  %s4282_s3 = inlined_call_operand.hbm [shape: f32[128,128], index: 3, kind: input, shape index: {}]   ;;  %s4283_s4 = inlined_call_operand.hbm [shape: f32[8,128,128], index: 4, kind: output, shape index: {}]  }
   0x1   :  { %4287 = sst [smem:[#allocation16_spill]] %s4279_s0 }
   0x2   :  { %4288 = sst [smem:[#allocation17_spill]] %s4281_s2 }
   0x3   :  { %9 = vsyncpa [#allocation3], 0 }
   0x4   :  { %11 = vsyncpa [#allocation3 + $0x1], 0 }
   0x5   :  { %12 = vsyncpa [#allocation6], 0 }
   0x6   :  { %14 = vsyncpa [#allocation6 + $0x1], 0 }
   0x7   :  { %15 = vsyncpa [#allocation9], 0 }
   0x8   :  { %16 = vsyncpa [#allocation4], 0 }
   0x9   :  { %18 = vsyncpa [#allocation4 + $0x1], 0  ;;  %s3620_s15 = smov 0   ;;  %s3622_s16 = smov 0  }
   0xa   :  { %s3624_s17 = smov 0   ;;  %s3626_s18 = smov 0  }
   0xb LB: > { %s3641_s19 = sadd.s32 4294967295, %s3582_s18   ;;  %s2527_s20 = sadd.s32 4294967294, %s3582_s18   ;;  %s3582_s18 = sphi %s3626_s18, %s4310_s18   ;;  %s3578_s17 = sphi %s3624_s17, %s4309_s17   ;;  %s3574_s16 = sphi %s3622_s16, %s4308_s16   ;;  %s3570_s15 = sphi %s3620_s15, %s4307_s15  }
   0xc   : > { %p44_p0 = scmp.ne.s32.totalorder %s3574_s16, %s3570_s15  ;;  %p4284_p1 = scmp.eq.s32.totalorder %s3641_s19, 0 }
   0xd   : > { %p142_p3 = scmp.eq.s32.totalorder %s2527_s20, 1  ;;  %p2528_p5 = scmp.ge.s32.totalorder %s3582_s18, 1 }
   0xe   : > { %p3650_p4 = por %p4284_p1, %p44_p0  ;;  %p149_p7 = scmp.lt.s32.totalorder %s3582_s18, 3 }
   0xf   : > { %p3655_p6 = por %p142_p3, %p44_p0  ;;  %s3584_s24 = smov [#allocation7]  }
  0x10   : > { %s4289_s21 = scalar_select %p3650_p4, 1, 0 }
  0x11   : > { %s4290_s22 = scalar_select %p3655_p6, 1, 0 }
  0x12   : > { %p3660_p8 = pnand %p2528_p5, %p149_p7  ;;  %s161_s25 = sshll.u32 %s3584_s24, 4  ;;  %s3664_s25 = int_to_ptr.vmem [resolvable:$true] %s161_s25 }
  0x13   : > { %s3585_s27 = smov [#allocation8]   ;;  %s4293_s2 = sld [smem:[#allocation17_spill]] }
  0x14   : > { %p3228_p9 = pneg %p3660_p8  ;;  %s174_s28 = sshll.u32 %s3585_s27, 4  ;;  %s3675_s28 = int_to_ptr.vmem [resolvable:$true] %s174_s28 }
  0x16   : > { %p3671_p11 = pnand %p3228_p9, %p4284_p1 }
  0x18   : > { %p3390_p13 = pneg %p3671_p11 }
  0x19   : > { %s3388_s5 = scalar_lea.hbm %s4293_s2, 2048 }
  0x1a   : > { %p3389_p12 = scmp.ne.s32.totalorder %s4293_s2, %s3388_s5  ;;  %p3395_p5 = scmp.lt.u32.totalorder %s3388_s5, %s4293_s2 }
  0x1c   : > { %p3391_p0 = pnand %p3390_p13, %p3389_p12 }
  0x1e   : > { %p3392_p3 = pneg %p3391_p0 }
  0x20   : > { %p3397_p7 = pnand %p3395_p5, %p3392_p3 }
  0x22   : > { %3400 = shalt.err (!%p3397_p7)
}
  0x23   : > { %s3401_s10 = scalar_lea.vmem %s3664_s25, 2048  ;;  %p3409_p2 = scmp.lt.s32.totalorder %s3664_s25, %s3664_s25 }
  0x24   : > { %p3402_p9 = scmp.ne.s32.totalorder %s3664_s25, %s3401_s10  ;;  %p3410_p12 = scmp.lt.s32.totalorder %s3401_s10, %s3401_s10 }
  0x26   : > { %p3404_p10 = pnand %p3402_p9, %p3390_p13  ;;  %p3411_p0 = por %p3410_p12, %p3409_p2 }
  0x28   : > { %p3405_p1 = pneg %p3404_p10 }
  0x2a   : > { %p3412_p6 = pnand %p3411_p0, %p3405_p1 }
  0x2c   : > { %3415 = shalt.err (!%p3412_p6)
}
  0x2d   : > { %s3586_s11 = smov 128   ;;  %s3587_s12 = smov 8  }
  0x2e   : > { %3231 = dma.hbm_to_vmem [thread:$0]  (!%p3671_p11), %s4293_s2, 2048, %s3664_s25, [#allocation6], %s3586_s11, %s3586_s11, %s3587_s12  }
  0x2f   : > { %s3416_s27 = scalar_lea.hbm %s4282_s3, 2048 }
  0x30   : > { %p3417_p1 = scmp.ne.s32.totalorder %s4282_s3, %s3416_s27  ;;  %p3423_p10 = scmp.lt.u32.totalorder %s3416_s27, %s4282_s3 }
  0x32   : > { %p3419_p2 = pnand %p3417_p1, %p3390_p13 }
  0x34   : > { %p3420_p6 = pneg %p3419_p2 }
  0x36   : > { %p3425_p3 = pnand %p3423_p10, %p3420_p6 }
  0x38   : > { %3428 = shalt.err (!%p3425_p3)
}
  0x39   : > { %s3429_s25 = scalar_lea.vmem %s3675_s28, 2048  ;;  %p3437_p12 = scmp.lt.s32.totalorder %s3675_s28, %s3675_s28 }
  0x3a   : > { %p3430_p5 = scmp.ne.s32.totalorder %s3675_s28, %s3429_s25  ;;  %p3438_p0 = scmp.lt.s32.totalorder %s3429_s25, %s3429_s25 }
  0x3c   : > { %p3432_p7 = pnand %p3430_p5, %p3390_p13  ;;  %p3439_p1 = por %p3438_p0, %p3437_p12 }
  0x3e   : > { %p3433_p9 = pneg %p3432_p7 }
  0x40   : > { %p3440_p2 = pnand %p3439_p1, %p3433_p9 }
  0x42   : > { %3443 = shalt.err (!%p3440_p2)
}
  0x43   : > { %3234 = dma.hbm_to_vmem [thread:$0]  (!%p3671_p11), %s4282_s3, 2048, %s3675_s28, [#allocation9], %s3586_s11, %s3586_s11, %s3587_s12  }
  0x44   : > { %s3736_s26 = sadd.s32 1, %s3582_s18   ;;  %s31_s9 = sadd.s32 1, %s3578_s17 }
  0x45   : > { %s28_s10 = ssub.s32 %s3582_s18, %s3736_s26  ;;  %p38_p13 = scmp.ne.s32.totalorder %s3578_s17, %s3574_s16 }
  0x46   : > { %p29_p6 = scmp.eq.s32.totalorder %s28_s10, 0  ;;  %p39_p10 = scmp.eq.s32.totalorder %s3582_s18, 0 }
  0x47   : > { %p4294_p3 = scmp.eq.s32.totalorder %s3641_s19, 1  ;;  %p3248_p7 = scmp.lt.s32.totalorder %s3582_s18, 2 }
  0x48   : > { %s3752_s14 = scalar_select %p29_p6, %s3578_s17, %s31_s9  }
  0x49   : > { %p3746_p5 = por %p4294_p3, %p38_p13  ;;  %p40_p9 = por %p39_p10, %p38_p13 }
  0x4a   : > { %s3755_s20 = sand.u32 1, %s3578_s17   ;;  %s2585_s24 = sshll.u32 %s3582_s18, 13 }
  0x4b   : > { %s4295_s13 = scalar_select %p3746_p5, 1, 0 }
  0x4c   : > { %s2532_s28 = sshll.u32 %s3755_s20, 9  ;;  %s4296_s0 = sld [smem:[#allocation16_spill]] }
  0x4d   : > { %s192_s5 = scalar_lea.vmem [#allocation2], %s2532_s28  ;;  %p3766_p11 = pnand %p3248_p7, %p40_p9 }
  0x4e   : > { %s200_s6 = sshll.u32 %s192_s5, 4  ;;  %s2536_s8 = sshll.u32 %s3755_s20, 8  ;;  %s3764_s6 = int_to_ptr.vmem [resolvable:$true] %s200_s6 }
  0x4f   : > { %s189_s9 = scalar_lea.sflag [#allocation3], %s3755_s20  ;;  %p3446_p0 = pneg %p3766_p11 }
  0x52   : > { %s3762_s30 = scalar_lea.hbm %s4296_s0, %s2585_s24  ;;  %s3449_s27 = scalar_lea.hbm %s4296_s0, 16384 }
  0x53   : > { %s3444_s10 = scalar_lea.hbm %s3762_s30, 8192  ;;  %p3450_p13 = scmp.lt.u32.totalorder %s3762_s30, %s4296_s0 }
  0x54   : > { %p3445_p12 = scmp.ne.s32.totalorder %s3762_s30, %s3444_s10  ;;  %p3451_p6 = scmp.lt.u32.totalorder %s3449_s27, %s3444_s10 }
  0x55   : > { %p3453_p3 = scmp.lt.u32.totalorder %s3444_s10, %s3762_s30 }
  0x56   : > { %p3447_p1 = pnand %p3446_p0, %p3445_p12  ;;  %p3452_p10 = por %p3451_p6, %p3450_p13 }
  0x58   : > { %p3448_p2 = pneg %p3447_p1  ;;  %p3454_p7 = por %p3453_p3, %p3452_p10 }
  0x5a   : > { %p3455_p9 = pnand %p3454_p7, %p3448_p2 }
  0x5c   : > { %3458 = shalt.err (!%p3455_p9)
}
  0x5d   : > { %s3459_s7 = scalar_lea.vmem %s3764_s6, 8192  ;;  %s3588_s28 = smov [#allocation2]  }
  0x5e   : > { %p3460_p12 = scmp.ne.s32.totalorder %s3764_s6, %s3459_s7  ;;  %s3464_s24 = sshll.u32 %s3588_s28, 4  ;;  %s3465_s24 = int_to_ptr.vmem [resolvable:$false] %s3464_s24 }
  0x5f   : > { %s3466_s29 = scalar_lea.vmem %s3465_s24, 16384  ;;  %p3467_p4 = scmp.lt.s32.totalorder %s3764_s6, %s3465_s24 }
  0x60   : > { %p3462_p1 = pnand %p3460_p12, %p3446_p0  ;;  %p3468_p13 = scmp.lt.s32.totalorder %s3466_s29, %s3459_s7 }
  0x62   : > { %p3463_p5 = pneg %p3462_p1  ;;  %p3469_p6 = por %p3468_p13, %p3467_p4 }
  0x64   : > { %p3470_p10 = pnand %p3469_p6, %p3463_p5 }
  0x66   : > { %3473 = shalt.err (!%p3470_p10)
}
  0x67   : > { %3238 = dma.hbm_to_vmem [thread:$0]  (!%p3766_p11), %s3762_s30, 8192, %s3764_s6, %s189_s9, %s3586_s11, %s3586_s11, %s3587_s12  }
  0x68   : > { %s2587_s10 = sshll.u32 %s3582_s18, 12  ;;  %s214_s28 = scalar_lea.vmem [#allocation5], %s2536_s8 }
  0x69   : > { %s3807_s5 = scalar_lea.hbm %s4280_s1, %s2587_s10  ;;  %s222_s24 = sshll.u32 %s214_s28, 4  ;;  %s3811_s24 = int_to_ptr.vmem [resolvable:$true] %s222_s24 }
  0x6a   : > { %s4298_s29 = sand.u32 1, %s3582_s18   ;;  %s3474_s2 = scalar_lea.hbm %s3807_s5, 4096 }
  0x6b   : > { %s3815_s0 = scalar_lea.sflag [#allocation6], %s4298_s29  ;;  %p3475_p4 = scmp.ne.s32.totalorder %s3807_s5, %s3474_s2 }
  0x6c   : > { %s3479_s20 = scalar_lea.hbm %s4280_s1, 8192  ;;  %p3480_p3 = scmp.lt.u32.totalorder %s3807_s5, %s4280_s1 }
  0x6d   : > { %p3477_p5 = pnand %p3475_p4, %p3446_p0  ;;  %p3481_p7 = scmp.lt.u32.totalorder %s3479_s20, %s3474_s2 }
  0x6e   : > { %p3483_p12 = scmp.lt.u32.totalorder %s3474_s2, %s3807_s5 }
  0x6f   : > { %p3478_p2 = pneg %p3477_p5  ;;  %p3482_p9 = por %p3481_p7, %p3480_p3 }
  0x71   : > { %p3484_p1 = por %p3483_p12, %p3482_p9 }
  0x73   : > { %p3485_p13 = pnand %p3484_p1, %p3478_p2 }
  0x75   : > { %3488 = shalt.err (!%p3485_p13)
}
  0x76   : > { %s3489_s8 = scalar_lea.vmem %s3811_s24, 4096  ;;  %s3589_s9 = smov [#allocation5]  }
  0x77   : > { %p3490_p6 = scmp.ne.s32.totalorder %s3811_s24, %s3489_s8  ;;  %s3494_s10 = sshll.u32 %s3589_s9, 4  ;;  %s3495_s10 = int_to_ptr.vmem [resolvable:$false] %s3494_s10 }
  0x78   : > { %s3496_s27 = scalar_lea.vmem %s3495_s10, 8192  ;;  %p3497_p5 = scmp.lt.s32.totalorder %s3811_s24, %s3495_s10 }
  0x79   : > { %p3492_p10 = pnand %p3490_p6, %p3446_p0  ;;  %p3498_p3 = scmp.lt.s32.totalorder %s3496_s27, %s3489_s8 }
  0x7b   : > { %p3493_p4 = pneg %p3492_p10  ;;  %p3499_p7 = por %p3498_p3, %p3497_p5 }
  0x7d   : > { %p3500_p9 = pnand %p3499_p7, %p3493_p4 }
  0x7f   : > { %3503 = shalt.err (!%p3500_p9)
}
  0x80   : > { %s3590_s2 = smov 64   ;;  %s3591_s7 = smov 4  }
  0x81   : > { %3241 = dma.hbm_to_vmem [thread:$0]  (!%p3766_p11), %s3807_s5, 4096, %s3811_s24, %s3815_s0, %s3590_s2, %s3590_s2, %s3591_s7  }
  0x82   : > { %234 = sbr.rel (%p3660_p8) target bundleno = 1254 (0x4e6), region = 36  ;;  %s3844_s28 = sand.u32 (!%p3660_p8), 1, %s3574_s16  }
  0x83   : > { %s2541_s29 = sshll.u32 (!%p3660_p8), %s3844_s28, 9  ;;  %s237_s11 = scalar_lea.sflag (!%p3660_p8), [#allocation3], %s3844_s28 }
  0x84   : > { %s3850_s12 = scalar_lea.vmem (!%p3660_p8), [#allocation2], %s2541_s29  ;;  %p4299_p0 = scmp.ne.s32.totalorder (!%p3660_p8), %s4289_s21, 0 }
  0x89   : > { %3549 = dma.done.wait (%p4299_p0), %s237_s11, 8192  }
  0x8a   : > { %3551 = vsyncadd (%p4299_p0), %s237_s11, 4294959104  ;;  %s245_s0 = sand.u32 1, %s3641_s19   ;;  %s2542_s23 = sshll.u32 %s3844_s28, 8 }
  0x8b   : > { %s246_s25 = scalar_lea.sflag [#allocation6], %s245_s0  ;;  %s3858_s5 = scalar_lea.vmem [#allocation5], %s2542_s23 }
  0x8c   : > { %3553 = dma.done.wait (%p4299_p0), %s246_s25, 4096  }
  0x8d   : > { %3555 = vsyncadd (%p4299_p0), %s246_s25, 4294963200  ;;  %p4300_p8 = scmp.eq.s32.totalorder %s3641_s19, 0 }
  0x8f   : > { %3557 = dma.done.wait (%p4300_p8), [#allocation6], 2048   ;;  %p4301_p11 = pmov %p4300_p8 }
  0x90   : > { %p4302_p2 = pmov %p4300_p8 }
  0x91   : > { %3559 = vsyncadd (%p4301_p11), [#allocation6], 4294965248 }
  0x92   : > { %3561 = dma.done.wait (%p4302_p2), [#allocation9], 2048   ;;  %p4303_p12 = pmov %p4302_p2 }
  0x93   : > { %v451_v0 = vld [vmem:[#allocation7] sm:$0xff]  ;;  %v452_v1 = vld [vmem:[#allocation7 + $0x8] sm:$0xff]  ;;  %v453_v2 = vld [vmem:[#allocation7 + $0x10] sm:$0xff]  ;;  %s4100_s21 = scalar_lea.vmem [#allocation10], %s2541_s29  ;;  %s2589_s24 = sshll.u32 %s3641_s19, 13 }
  0x94   : > { %3563 = vsyncadd (%p4303_p12), [#allocation9], 4294965248  ;;  %v467_v3 = vpack.c.bf16 %v452_v1, %v451_v0  ;;  %v454_v4 = vld [vmem:[#allocation7 + $0x18] sm:$0xff]  ;;  %v455_v6 = vld [vmem:[#allocation7 + $0x20] sm:$0xff]  ;;  %s2412_s20 = sshll.u32 %s4100_s21, 4  ;;  %s4229_s8 = scalar_lea.hbm %s4283_s4, %s2589_s24  ;;  %s4231_s20 = int_to_ptr.vmem [resolvable:$true] %s2412_s20 }
  0x95   : > { %v468_v5 = vpack.c.bf16 %v454_v4, %v453_v2  ;;  %v456_v7 = vld [vmem:[#allocation7 + $0x28] sm:$0xff]  ;;  %v291_v9 = vld [vmem:[%s3850_s12] sm:$0xff]  ;;  %v457_v11 = vld [vmem:[#allocation7 + $0x30] sm:$0xff]  ;;  %s2398_s19 = scalar_lea.sflag [#allocation4], %s3844_s28  ;;  %s3504_s9 = scalar_lea.vmem %s4231_s20, 8192 }
  0x96   : > { %2798 = vmatprep.subr.bf16.mxu0 %v467_v3  ;;  %v469_v8 = vpack.c.bf16 %v456_v7, %v455_v6  ;;  %v292_v10 = vld [vmem:[%s3850_s12 + $0x8] sm:$0xff]  ;;  %v458_v12 = vld [vmem:[#allocation7 + $0x38] sm:$0xff]  ;;  %v459_v15 = vld [vmem:[#allocation7 + $0x40] sm:$0xff]  ;;  %p3505_p1 = scmp.ne.s32.totalorder %s4231_s20, %s3504_s9  ;;  %p4304_p13 = scmp.ne.s32.totalorder %s4295_s13, 0 }
  0x97   : > { %2799 = vmatpush3.bf16.msra.mxu0 %v467_v3  ;;  %v355_v13 = vpack.c.bf16 %v292_v10, %v291_v9  ;;  %v470_v14 = vpack.c.bf16 %v458_v12, %v457_v11  ;;  %v460_v16 = vld [vmem:[#allocation7 + $0x48] sm:$0xff]  ;;  %v461_v18 = vld [vmem:[#allocation7 + $0x50] sm:$0xff]  ;;  %v462_v19 = vld [vmem:[#allocation7 + $0x58] sm:$0xff]  ;;  %s3592_s10 = smov [#allocation10]  }
  0x98   : > { %2800 = vmatprep.subr.bf16.mxu0 %v468_v5  ;;  %v471_v17 = vpack.c.bf16 %v460_v16, %v459_v15  ;;  %v472_v20 = vpack.c.bf16 %v462_v19, %v461_v18  ;;  %v463_v21 = vld [vmem:[#allocation7 + $0x60] sm:$0xff]  ;;  %v464_v22 = vld [vmem:[#allocation7 + $0x68] sm:$0xff]  ;;  %v465_v24 = vld [vmem:[#allocation7 + $0x70] sm:$0xff]  ;;  %p3506_p6 = pnand %p3505_p1, %p4304_p13  ;;  %s3508_s27 = sshll.u32 %s3592_s10, 4  ;;  %s3509_s27 = int_to_ptr.vmem [resolvable:$false] %s3508_s27 }
  0x99   : > { %2814 = vmatprep.mubr.bf16.mxu0 %v355_v13  ;;  %v473_v23 = vpack.c.bf16 %v464_v22, %v463_v21  ;;  %v466_v25 = vld [vmem:[#allocation7 + $0x78] sm:$0xff]  ;;  %v293_v27 = vld [vmem:[%s3850_s12 + $0x10] sm:$0xff]  ;;  %v295_v29 = vld [vmem:[%s3850_s12 + $0x20] sm:$0xff]  ;;  %s3510_s2 = scalar_lea.vmem %s3509_s27, 16384  ;;  %p3511_p4 = scmp.lt.s32.totalorder %s4231_s20, %s3509_s27 }
  0x9a   : > { %v474_v26 = vpack.c.bf16 %v466_v25, %v465_v24  ;;  %v294_v28 = vld [vmem:[%s3850_s12 + $0x18] sm:$0xff]  ;;  %v296_v30 = vld [vmem:[%s3850_s12 + $0x28] sm:$0xff]  ;;  %v297_v33 = vld [vmem:[%s3850_s12 + $0x30] sm:$0xff]  ;;  %p3507_p10 = pneg %p3506_p6  ;;  %p3512_p5 = scmp.lt.s32.totalorder %s3510_s2, %s3504_s9 }
  0x9b   : > { %2801 = vmatpush3.bf16.msra.mxu0 %v468_v5  ;;  %v356_v31 = vpack.c.bf16 %v294_v28, %v293_v27  ;;  %v357_v32 = vpack.c.bf16 %v296_v30, %v295_v29  ;;  %v298_v34 = vld [vmem:[%s3850_s12 + $0x38] sm:$0xff]  ;;  %v299_v35 = vld [vmem:[%s3850_s12 + $0x40] sm:$0xff]  ;;  %v300_v36 = vld [vmem:[%s3850_s12 + $0x48] sm:$0xff] }
  0x9c   : > { %2802 = vmatprep.subr.bf16.mxu0 %v469_v8  ;;  %v358_v37 = vpack.c.bf16 %v298_v34, %v297_v33  ;;  %v359_v38 = vpack.c.bf16 %v300_v36, %v299_v35  ;;  %v301_v39 = vld [vmem:[%s3850_s12 + $0x50] sm:$0xff]  ;;  %v302_v40 = vld [vmem:[%s3850_s12 + $0x58] sm:$0xff]  ;;  %v303_v41 = vld [vmem:[%s3850_s12 + $0x60] sm:$0xff]  ;;  %p3513_p3 = por %p3512_p5, %p3511_p4 }
  0x9d   : > { %v304_v42 = vld [vmem:[%s3850_s12 + $0x68] sm:$0xff]  ;;  %v360_v43 = vpack.c.bf16 %v302_v40, %v301_v39  ;;  %v305_v45 = vld [vmem:[%s3850_s12 + $0x70] sm:$0xff]  ;;  %v306_v46 = vld [vmem:[%s3850_s12 + $0x78] sm:$0xff] }
  0x9e   : > { %v361_v44 = vpack.c.bf16 %v304_v42, %v303_v41  ;;  %v307_v47 = vld [vmem:[%s3850_s12 + $0x80] sm:$0xff]  ;;  %v308_v48 = vld [vmem:[%s3850_s12 + $0x88] sm:$0xff]  ;;  %v362_v49 = vpack.c.bf16 %v306_v46, %v305_v45  ;;  %v309_v51 = vld [vmem:[%s3850_s12 + $0x90] sm:$0xff]  ;;  %p3514_p7 = pnand %p3513_p3, %p3507_p10 }
  0x9f   : > { %2803 = vmatpush3.bf16.msra.mxu0 %v469_v8  ;;  %v363_v50 = vpack.c.bf16 %v308_v48, %v307_v47  ;;  %v310_v52 = vld [vmem:[%s3850_s12 + $0x98] sm:$0xff]  ;;  %v311_v53 = vld [vmem:[%s3850_s12 + $0xa0] sm:$0xff]  ;;  %v312_v54 = vld [vmem:[%s3850_s12 + $0xa8] sm:$0xff] }
  0xa0   : > { %2804 = vmatprep.subr.bf16.mxu0 %v470_v14  ;;  %v364_v55 = vpack.c.bf16 %v310_v52, %v309_v51  ;;  %v365_v56 = vpack.c.bf16 %v312_v54, %v311_v53  ;;  %v313_v57 = vld [vmem:[%s3850_s12 + $0xb0] sm:$0xff]  ;;  %v314_v58 = vld [vmem:[%s3850_s12 + $0xb8] sm:$0xff]  ;;  %v315_v59 = vld [vmem:[%s3850_s12 + $0xc0] sm:$0xff] }
  0xa1   : > { %v316_v60 = vld [vmem:[%s3850_s12 + $0xc8] sm:$0xff]  ;;  %v366_v61 = vpack.c.bf16 %v314_v58, %v313_v57  ;;  %v317_v63 = vld [vmem:[%s3850_s12 + $0xd0] sm:$0xff]  ;;  %v318_v0 = vld [vmem:[%s3850_s12 + $0xd8] sm:$0xff] }
  0xa2   : > { %v367_v62 = vpack.c.bf16 %v316_v60, %v315_v59  ;;  %v319_v1 = vld [vmem:[%s3850_s12 + $0xe0] sm:$0xff]  ;;  %v320_v2 = vld [vmem:[%s3850_s12 + $0xe8] sm:$0xff]  ;;  %v368_v3 = vpack.c.bf16 %v318_v0, %v317_v63  ;;  %v321_v5 = vld [vmem:[%s3850_s12 + $0xf0] sm:$0xff] }
  0xa3   : > { %2805 = vmatpush3.bf16.msra.mxu0 %v470_v14  ;;  %v369_v4 = vpack.c.bf16 %v320_v2, %v319_v1  ;;  %v322_v6 = vld [vmem:[%s3850_s12 + $0xf8] sm:$0xff]  ;;  %v323_v7 = vld [vmem:[%s3850_s12 + $0x100] sm:$0xff]  ;;  %v324_v8 = vld [vmem:[%s3850_s12 + $0x108] sm:$0xff] }
  0xa4   : > { %2806 = vmatprep.subr.bf16.mxu0 %v471_v17  ;;  %v370_v9 = vpack.c.bf16 %v322_v6, %v321_v5  ;;  %v371_v10 = vpack.c.bf16 %v324_v8, %v323_v7  ;;  %v325_v11 = vld [vmem:[%s3850_s12 + $0x110] sm:$0xff]  ;;  %v326_v12 = vld [vmem:[%s3850_s12 + $0x118] sm:$0xff]  ;;  %v327_v13 = vld [vmem:[%s3850_s12 + $0x120] sm:$0xff] }
  0xa5   : > { %v328_v14 = vld [vmem:[%s3850_s12 + $0x128] sm:$0xff]  ;;  %v372_v15 = vpack.c.bf16 %v326_v12, %v325_v11  ;;  %v330_v18 = vld [vmem:[%s3850_s12 + $0x138] sm:$0xff]  ;;  %v331_v19 = vld [vmem:[%s3850_s12 + $0x140] sm:$0xff] }
  0xa6   : > { %v373_v16 = vpack.c.bf16 %v328_v14, %v327_v13  ;;  %v334_v24 = vld [vmem:[%s3850_s12 + $0x158] sm:$0xff]  ;;  %v335_v25 = vld [vmem:[%s3850_s12 + $0x160] sm:$0xff]  ;;  %v337_v29 = vld [vmem:[%s3850_s12 + $0x170] sm:$0xff] }
  0xa7   : > { %2807 = vmatpush3.bf16.msra.mxu0 %v471_v17  ;;  %v329_v17 = vld [vmem:[%s3850_s12 + $0x130] sm:$0xff]  ;;  %v338_v30 = vld [vmem:[%s3850_s12 + $0x178] sm:$0xff]  ;;  %v476_v63 = vld [vmem:[#allocation8 + $0x8] sm:$0xff] }
  0xa8   : > { %2808 = vmatprep.subr.bf16.mxu0 %v472_v20  ;;  %v374_v21 = vpack.c.bf16 %v330_v18, %v329_v17  ;;  %v378_v33 = vpack.c.bf16 %v338_v30, %v337_v29  ;;  %v341_v35 = vld [vmem:[%s3850_s12 + $0x190] sm:$0xff]  ;;  %v342_v36 = vld [vmem:[%s3850_s12 + $0x198] sm:$0xff] }
  0xa9   : > { %v380_v39 = vpack.c.bf16 %v342_v36, %v341_v35  ;;  %v345_v41 = vld [vmem:[%s3850_s12 + $0x1b0] sm:$0xff]  ;;  %v346_v42 = vld [vmem:[%s3850_s12 + $0x1b8] sm:$0xff] }
  0xaa   : > { %v382_v45 = vpack.c.bf16 %v346_v42, %v345_v41  ;;  %v349_v47 = vld [vmem:[%s3850_s12 + $0x1d0] sm:$0xff]  ;;  %v350_v48 = vld [vmem:[%s3850_s12 + $0x1d8] sm:$0xff] }
  0xab   : > { %2809 = vmatpush3.bf16.msra.mxu0 %v472_v20  ;;  %v332_v20 = vld [vmem:[%s3850_s12 + $0x148] sm:$0xff]  ;;  %v384_v51 = vpack.c.bf16 %v350_v48, %v349_v47  ;;  %v353_v53 = vld [vmem:[%s3850_s12 + $0x1f0] sm:$0xff]  ;;  %v354_v54 = vld [vmem:[%s3850_s12 + $0x1f8] sm:$0xff] }
  0xac   : > { %2810 = vmatprep.subr.bf16.mxu0 %v473_v23  ;;  %v375_v22 = vpack.c.bf16 %v332_v20, %v331_v19  ;;  %v477_v8 = vld [vmem:[#allocation8 + $0x10] sm:$0xff]  ;;  %v486_v41 = vld [vmem:[#allocation8 + $0x58] sm:$0xff]  ;;  %v487_v47 = vld [vmem:[#allocation8 + $0x60] sm:$0xff] }
  0xad   : > { %v488_v48 = vld [vmem:[#allocation8 + $0x68] sm:$0xff] }
  0xaf   : > { %2811 = vmatpush3.bf16.msra.mxu0 %v473_v23  ;;  %v333_v23 = vld [vmem:[%s3850_s12 + $0x150] sm:$0xff] }
  0xb0   : > { %2812 = vmatprep.subr.bf16.mxu0 %v474_v26  ;;  %v376_v27 = vpack.c.bf16 %v334_v24, %v333_v23  ;;  %v479_v23 = vld [vmem:[#allocation8 + $0x20] sm:$0xff]  ;;  %v480_v24 = vld [vmem:[#allocation8 + $0x28] sm:$0xff] }
  0xb3   : > { %2813 = vmatpush3.bf16.msra.mxu0 %v474_v26  ;;  %v336_v26 = vld [vmem:[%s3850_s12 + $0x168] sm:$0xff] }
  0xb4   : > { %v377_v28 = vpack.c.bf16 %v336_v26, %v335_v25  ;;  %v481_v25 = vld [vmem:[#allocation8 + $0x30] sm:$0xff]  ;;  %v493_v26 = vpack.c.bf16 %v480_v24, %v479_v23  ;;  %v3984_v24 = vld [vmem:[%s3858_s5 + $0x60] sm:$0xff]  }
  0xb6   : > { %2815 = vmatmul.mubr.bf16.vlgmr.msra.gmra.mrb[0].mxu0 %v356_v31  ;;  %v339_v31 = vld [vmem:[%s3850_s12 + $0x180] sm:$0xff] }
  0xb7   : > { %2818 = vmatprep.mubr.bf16.mxu0 %v357_v32  ;;  %v340_v32 = vld [vmem:[%s3850_s12 + $0x188] sm:$0xff] }
  0xb8   : > { %v379_v34 = vpack.c.bf16 %v340_v32, %v339_v31  ;;  %v3941_v32 = vld [vmem:[%s3858_s5 + $0x8] sm:$0xff]  }
  0xbe   : > { %2819 = vmatmul.mubr.bf16.gmra.mrb[4].mxu0 %v358_v37  ;;  %v343_v37 = vld [vmem:[%s3850_s12 + $0x1a0] sm:$0xff] }
  0xbf   : > { %2822 = vmatprep.mubr.bf16.mxu0 %v359_v38  ;;  %v344_v38 = vld [vmem:[%s3850_s12 + $0x1a8] sm:$0xff] }
  0xc0   : > { %v381_v40 = vpack.c.bf16 %v344_v38, %v343_v37  ;;  %v3944_v37 = vld [vmem:[%s3858_s5 + $0x10] sm:$0xff]  }
  0xc6   : > { %2823 = vmatmul.mubr.bf16.gmra.mrb[8].mxu0 %v360_v43  ;;  %v347_v43 = vld [vmem:[%s3850_s12 + $0x1c0] sm:$0xff] }
  0xc7   : > { %2826 = vmatprep.mubr.bf16.mxu0 %v361_v44  ;;  %v348_v44 = vld [vmem:[%s3850_s12 + $0x1c8] sm:$0xff] }
  0xc8   : > { %v383_v46 = vpack.c.bf16 %v348_v44, %v347_v43 }
  0xce   : > { %2827 = vmatmul.mubr.bf16.gmra.mrb[12].mxu0 %v362_v49  ;;  %v351_v49 = vld [vmem:[%s3850_s12 + $0x1e0] sm:$0xff] }
  0xcf   : > { %2830 = vmatprep.mubr.bf16.mxu0 %v363_v50  ;;  %v352_v50 = vld [vmem:[%s3850_s12 + $0x1e8] sm:$0xff] }
  0xd0   : > { %v385_v52 = vpack.c.bf16 %v352_v50, %v351_v49 }
  0xd6   : > { %2831 = vmatmul.mubr.bf16.gmra.mrb[16].mxu0 %v364_v55  ;;  %v386_v55 = vpack.c.bf16 %v354_v54, %v353_v53  ;;  %v497_v53 = vpack.c.bf16 %v488_v48, %v487_v47  ;;  %v489_v54 = vld [vmem:[#allocation8 + $0x70] sm:$0xff]  ;;  %v4005_v48 = vld [vmem:[%s3858_s5 + $0x88] sm:$0xff]  }
  0xd7   : > { %2834 = vmatprep.mubr.bf16.mxu0 %v365_v56  ;;  %v3937_v56 = vld [vmem:[%s3858_s5] sm:$0xff]  }
  0xd8   : > { %2894 = vmatprep.mubr.bf16.mxu1 %v3937_v56 }
  0xde   : > { %2835 = vmatmul.mubr.bf16.gmra.mrb[20].mxu0 %v366_v61 }
  0xdf   : > { %2838 = vmatprep.mubr.bf16.mxu0 %v367_v62  ;;  %v475_v62 = vld [vmem:[#allocation8] sm:$0xff] }
  0xe0   : > { %v491_v1 = vpack.c.bf16 %v476_v63, %v475_v62 }
  0xe2   : > { %3006 = vmatprep.subr.bf16.mxu0 %v491_v1 }
  0xe3   : > { %3007 = vmatpush3.bf16.msra.mxu0 %v491_v1 }
  0xe6   : > { %2839 = vmatmul.mubr.bf16.gmra.mrb[24].mxu0 %v368_v3 }
  0xe7   : > { %2842 = vmatprep.mubr.bf16.mxu0 %v369_v4 }
  0xee   : > { %2843 = vmatmul.mubr.bf16.gmra.mrb[28].mxu0 %v370_v9  ;;  %v478_v9 = vld [vmem:[#allocation8 + $0x18] sm:$0xff] }
  0xef   : > { %2846 = vmatprep.mubr.bf16.mxu0 %v371_v10  ;;  %v492_v10 = vpack.c.bf16 %v478_v9, %v477_v8  ;;  %v3968_v8 = vld [vmem:[%s3858_s5 + $0x40] sm:$0xff]  }
  0xf1   : > { %3008 = vmatprep.subr.bf16.mxu0 %v492_v10 }
  0xf2   : > { %3009 = vmatpush3.bf16.msra.mxu0 %v492_v10 }
  0xf3   : > { %3010 = vmatprep.subr.bf16.mxu0 %v493_v26 }
  0xf6   : > { %2847 = vmatmul.mubr.bf16.gmra.mrb[32].mxu0 %v372_v15 }
  0xf7   : > { %2850 = vmatprep.mubr.bf16.mxu0 %v373_v16  ;;  %3011 = vmatpush3.bf16.msra.mxu0 %v493_v26 }
  0xfe   : > { %2851 = vmatmul.mubr.bf16.gmra.mrb[36].mxu0 %v374_v21 }
  0xff   : > { %2854 = vmatprep.mubr.bf16.mxu0 %v375_v22 }
 0x106   : > { %2855 = vmatmul.mubr.bf16.gmra.mrb[40].mxu0 %v376_v27  ;;  %v482_v27 = vld [vmem:[#allocation8 + $0x38] sm:$0xff] }
 0x107   : > { %2858 = vmatprep.mubr.bf16.mxu0 %v377_v28  ;;  %v494_v29 = vpack.c.bf16 %v482_v27, %v481_v25 }
 0x109   : > { %3012 = vmatprep.subr.bf16.mxu0 %v494_v29 }
 0x10a   : > { %3013 = vmatpush3.bf16.msra.mxu0 %v494_v29  ;;  %v3989_v29 = vld [vmem:[%s3858_s5 + $0x68] sm:$0xff]  }
 0x10e   : > { %2859 = vmatmul.mubr.bf16.gmra.mrb[44].mxu0 %v378_v33  ;;  %v483_v33 = vld [vmem:[#allocation8 + $0x40] sm:$0xff] }
 0x10f   : > { %2862 = vmatprep.mubr.bf16.mxu0 %v379_v34  ;;  %v484_v34 = vld [vmem:[#allocation8 + $0x48] sm:$0xff] }
 0x116   : > { %2863 = vmatmul.mubr.bf16.gmra.mrb[48].mxu0 %v380_v39  ;;  %v495_v39 = vpack.c.bf16 %v484_v34, %v483_v33  ;;  %v3992_v33 = vld [vmem:[%s3858_s5 + $0x70] sm:$0xff]  }
 0x117   : > { %2866 = vmatprep.mubr.bf16.mxu0 %v381_v40  ;;  %v485_v40 = vld [vmem:[#allocation8 + $0x50] sm:$0xff] }
 0x118   : > { %3014 = vmatprep.subr.bf16.mxu0 %v495_v39  ;;  %v496_v44 = vpack.c.bf16 %v486_v41, %v485_v40 }
 0x119   : > { %3015 = vmatpush3.bf16.msra.mxu0 %v495_v39  ;;  %v3997_v39 = vld [vmem:[%s3858_s5 + $0x78] sm:$0xff]  }
 0x11a   : > { %3016 = vmatprep.subr.bf16.mxu0 %v496_v44 }
 0x11d   : > { %3017 = vmatpush3.bf16.msra.mxu0 %v496_v44 }
 0x11e   : > { %2867 = vmatmul.mubr.bf16.gmra.mrb[52].mxu0 %v382_v45  ;;  %3018 = vmatprep.subr.bf16.mxu0 %v497_v53 }
 0x11f   : > { %2870 = vmatprep.mubr.bf16.mxu0 %v383_v46  ;;  %v3949_v46 = vld [vmem:[%s3858_s5 + $0x18] sm:$0xff]  }
 0x121   : > { %3019 = vmatpush3.bf16.msra.mxu0 %v497_v53 }
 0x126   : > { %2871 = vmatmul.mubr.bf16.gmra.mrb[56].mxu0 %v384_v51  ;;  %v3952_v51 = vld [vmem:[%s3858_s5 + $0x20] sm:$0xff]  }
 0x127   : > { %2874 = vmatprep.mubr.bf16.mxu0 %v385_v52 }
 0x12e   : > { %2875 = vmatmul.mubr.bf16.gmra.mrb[60].mxu0 %v386_v55  ;;  %v490_v55 = vld [vmem:[#allocation8 + $0x78] sm:$0xff] }
 0x189   : > { %v2816_v57 = vpop.f32.mrb[0].mxu0 }
 0x18a   : > { %v533_v58 = vpop.f32.mrb[1].mxu0 }
 0x18b   : > { %v2817_v59 = vpop.f32.mrb[2].mxu0 }
 0x18c   : > { %v789_v60 = vpack.c.bf16 %v2817_v59, %v2816_v57  ;;  %v536_v61 = vpop.f32.mrb[3].mxu0  ;;  %v498_v59 = vpack.c.bf16 %v490_v55, %v489_v54 }
 0x18d   : > { %v788_v0 = vpack.c.bf16 %v536_v61, %v533_v58  ;;  %v3957_v61 = vld [vmem:[%s3858_s5 + $0x28] sm:$0xff]  }
 0x18e   : > { %3020 = vmatprep.subr.bf16.mxu0 %v498_v59 }
 0x18f   : > { %2878 = vmatprep.subr.bf16.mxu1 %v788_v0  ;;  %3021 = vmatpush3.bf16.msra.mxu0 %v498_v59 }
 0x190   : > { %2879 = vmatpush3.bf16.msra.mxu1 %v788_v0  ;;  %v3960_v0 = vld [vmem:[%s3858_s5 + $0x30] sm:$0xff]  }
 0x191   : > { %v2820_v2 = vpop.f32.mrb[4].mxu0  ;;  %2880 = vmatprep.subr.bf16.mxu1 %v789_v60 }
 0x192   : > { %v549_v3 = vpop.f32.mrb[5].mxu0 }
 0x193   : > { %v2821_v4 = vpop.f32.mrb[6].mxu0 }
 0x194   : > { %v791_v5 = vpack.c.bf16 %v2821_v4, %v2820_v2  ;;  %v552_v6 = vpop.f32.mrb[7].mxu0  ;;  %2881 = vmatpush3.bf16.msra.mxu1 %v789_v60 }
 0x195   : > { %v790_v7 = vpack.c.bf16 %v552_v6, %v549_v3 }
 0x197   : > { %2882 = vmatprep.subr.bf16.mxu1 %v790_v7 }
 0x198   : > { %2883 = vmatpush3.bf16.msra.mxu1 %v790_v7 }
 0x199   : > { %v2824_v11 = vpop.f32.mrb[8].mxu0  ;;  %2884 = vmatprep.subr.bf16.mxu1 %v791_v5 }
 0x19a   : > { %v565_v12 = vpop.f32.mrb[9].mxu0 }
 0x19b   : > { %v2825_v13 = vpop.f32.mrb[10].mxu0 }
 0x19c   : > { %v793_v14 = vpack.c.bf16 %v2825_v13, %v2824_v11  ;;  %v568_v15 = vpop.f32.mrb[11].mxu0  ;;  %2885 = vmatpush3.bf16.msra.mxu1 %v791_v5  ;;  %v3965_v5 = vld [vmem:[%s3858_s5 + $0x38] sm:$0xff]   ;;  %v3973_v13 = vld [vmem:[%s3858_s5 + $0x48] sm:$0xff]  }
 0x19d   : > { %v792_v16 = vpack.c.bf16 %v568_v15, %v565_v12 }
 0x19f   : > { %2886 = vmatprep.subr.bf16.mxu1 %v792_v16 }
 0x1a0   : > { %2887 = vmatpush3.bf16.msra.mxu1 %v792_v16  ;;  %v3976_v16 = vld [vmem:[%s3858_s5 + $0x50] sm:$0xff]  }
 0x1a1   : > { %v2828_v17 = vpop.f32.mrb[12].mxu0  ;;  %2888 = vmatprep.subr.bf16.mxu1 %v793_v14 }
 0x1a2   : > { %v581_v18 = vpop.f32.mrb[13].mxu0 }
 0x1a3   : > { %v2829_v19 = vpop.f32.mrb[14].mxu0 }
 0x1a4   : > { %v795_v20 = vpack.c.bf16 %v2829_v19, %v2828_v17  ;;  %v584_v21 = vpop.f32.mrb[15].mxu0  ;;  %2889 = vmatpush3.bf16.msra.mxu1 %v793_v14 }
 0x1a5   : > { %v794_v22 = vpack.c.bf16 %v584_v21, %v581_v18  ;;  %v3981_v21 = vld [vmem:[%s3858_s5 + $0x58] sm:$0xff]  }
 0x1a7   : > { %2890 = vmatprep.subr.bf16.mxu1 %v794_v22 }
 0x1a8   : > { %2891 = vmatpush3.bf16.msra.mxu1 %v794_v22 }
 0x1a9   : > { %v2832_v28 = vpop.f32.mrb[16].mxu0  ;;  %2892 = vmatprep.subr.bf16.mxu1 %v795_v20 }
 0x1aa   : > { %v597_v30 = vpop.f32.mrb[17].mxu0 }
 0x1ab   : > { %v2833_v31 = vpop.f32.mrb[18].mxu0 }
 0x1ac   : > { %v797_v35 = vpack.c.bf16 %v2833_v31, %v2832_v28  ;;  %v600_v36 = vpop.f32.mrb[19].mxu0  ;;  %2893 = vmatpush3.bf16.msra.mxu1 %v795_v20 }
 0x1ad   : > { %v796_v38 = vpack.c.bf16 %v600_v36, %v597_v30 }
 0x1af   : > { %2895 = vmatmul.mubr.bf16.vlgmr.msra.gmra.mrb[0].mxu1 %v3941_v32  ;;  %2910 = vmatprep.subr.bf16.mxu1 %v796_v38 }
 0x1b0   : > { %2911 = vmatpush3.bf16.msra.mxu1 %v796_v38  ;;  %2898 = vmatprep.mubr.bf16.mxu1 %v3944_v37 }
 0x1b1   : > { %v2836_v42 = vpop.f32.mrb[20].mxu0  ;;  %2912 = vmatprep.subr.bf16.mxu1 %v797_v35 }
 0x1b2   : > { %v613_v43 = vpop.f32.mrb[21].mxu0 }
 0x1b3   : > { %v2837_v45 = vpop.f32.mrb[22].mxu0 }
 0x1b4   : > { %v799_v49 = vpack.c.bf16 %v2837_v45, %v2836_v42  ;;  %v616_v50 = vpop.f32.mrb[23].mxu0  ;;  %2913 = vmatpush3.bf16.msra.mxu1 %v797_v35  ;;  %v4000_v42 = vld [vmem:[%s3858_s5 + $0x80] sm:$0xff]  }
 0x1b5   : > { %v798_v52 = vpack.c.bf16 %v616_v50, %v613_v43 }
 0x1b7   : > { %2899 = vmatmul.mubr.bf16.gmra.mrb[4].mxu1 %v3949_v46  ;;  %2914 = vmatprep.subr.bf16.mxu1 %v798_v52 }
 0x1b8   : > { %2915 = vmatpush3.bf16.msra.mxu1 %v798_v52  ;;  %2902 = vmatprep.mubr.bf16.mxu1 %v3952_v51  ;;  %v4008_v52 = vld [vmem:[%s3858_s5 + $0x90] sm:$0xff]  }
 0x1b9   : > { %v2840_v57 = vpop.f32.mrb[24].mxu0  ;;  %2916 = vmatprep.subr.bf16.mxu1 %v799_v49 }
 0x1ba   : > { %v629_v58 = vpop.f32.mrb[25].mxu0 }
 0x1bb   : > { %v2841_v60 = vpop.f32.mrb[26].mxu0 }
 0x1bc   : > { %v801_v62 = vpack.c.bf16 %v2841_v60, %v2840_v57  ;;  %v632_v63 = vpop.f32.mrb[27].mxu0  ;;  %2917 = vmatpush3.bf16.msra.mxu1 %v799_v49 }
 0x1bd   : > { %v800_v1 = vpack.c.bf16 %v632_v63, %v629_v58  ;;  %v4013_v58 = vld [vmem:[%s3858_s5 + $0x98] sm:$0xff]  }
 0x1bf   : > { %2903 = vmatmul.mubr.bf16.gmra.mrb[8].mxu1 %v3957_v61  ;;  %2918 = vmatprep.subr.bf16.mxu1 %v800_v1 }
 0x1c0   : > { %2919 = vmatpush3.bf16.msra.mxu1 %v800_v1  ;;  %2906 = vmatprep.mubr.bf16.mxu1 %v3960_v0 }
 0x1c1   : > { %v2844_v2 = vpop.f32.mrb[28].mxu0  ;;  %2920 = vmatprep.subr.bf16.mxu1 %v801_v62 }
 0x1c2   : > { %v645_v3 = vpop.f32.mrb[29].mxu0 }
 0x1c3   : > { %v2845_v4 = vpop.f32.mrb[30].mxu0 }
 0x1c4   : > { %v803_v6 = vpack.c.bf16 %v2845_v4, %v2844_v2  ;;  %v648_v7 = vpop.f32.mrb[31].mxu0  ;;  %2921 = vmatpush3.bf16.msra.mxu1 %v801_v62  ;;  %v4016_v62 = vld [vmem:[%s3858_s5 + $0xa0] sm:$0xff]   ;;  %v4021_v4 = vld [vmem:[%s3858_s5 + $0xa8] sm:$0xff]  }
 0x1c5   : > { %v802_v9 = vpack.c.bf16 %v648_v7, %v645_v3 }
 0x1c7   : > { %2907 = vmatmul.mubr.bf16.gmra.mrb[12].mxu1 %v3965_v5  ;;  %2922 = vmatprep.subr.bf16.mxu1 %v802_v9 }
 0x1c8   : > { %2923 = vmatpush3.bf16.msra.mxu1 %v802_v9  ;;  %2926 = vmatprep.mubr.bf16.mxu1 %v3968_v8  ;;  %v4024_v9 = vld [vmem:[%s3858_s5 + $0xb0] sm:$0xff]  }
 0x1c9   : > { %v2848_v10 = vpop.f32.mrb[32].mxu0  ;;  %2924 = vmatprep.subr.bf16.mxu1 %v803_v6 }
 0x1ca   : > { %v661_v11 = vpop.f32.mrb[33].mxu0 }
 0x1cb   : > { %v2849_v12 = vpop.f32.mrb[34].mxu0 }
 0x1cc   : > { %v805_v14 = vpack.c.bf16 %v2849_v12, %v2848_v10  ;;  %v664_v15 = vpop.f32.mrb[35].mxu0  ;;  %2925 = vmatpush3.bf16.msra.mxu1 %v803_v6 }
 0x1cd   : > { %v804_v17 = vpack.c.bf16 %v664_v15, %v661_v11  ;;  %v4029_v15 = vld [vmem:[%s3858_s5 + $0xb8] sm:$0xff]  }
 0x1cf   : > { %2927 = vmatmul.mubr.bf16.vlgmr.msra.gmra.mrb[16].mxu1 %v3973_v13  ;;  %2942 = vmatprep.subr.bf16.mxu1 %v804_v17 }
 0x1d0   : > { %2943 = vmatpush3.bf16.msra.mxu1 %v804_v17  ;;  %2930 = vmatprep.mubr.bf16.mxu1 %v3976_v16 }
 0x1d1   : > { %v2852_v18 = vpop.f32.mrb[36].mxu0  ;;  %2944 = vmatprep.subr.bf16.mxu1 %v805_v14 }
 0x1d2   : > { %v677_v19 = vpop.f32.mrb[37].mxu0 }
 0x1d3   : > { %v2853_v20 = vpop.f32.mrb[38].mxu0 }
 0x1d4   : > { %v807_v22 = vpack.c.bf16 %v2853_v20, %v2852_v18  ;;  %v680_v23 = vpop.f32.mrb[39].mxu0  ;;  %2945 = vmatpush3.bf16.msra.mxu1 %v805_v14 }
 0x1d5   : > { %v806_v25 = vpack.c.bf16 %v680_v23, %v677_v19  ;;  %v4032_v19 = vld [vmem:[%s3858_s5 + $0xc0] sm:$0xff]   ;;  %v4040_v23 = vld [vmem:[%s3858_s5 + $0xd0] sm:$0xff]  }
 0x1d7   : > { %2931 = vmatmul.mubr.bf16.gmra.mrb[20].mxu1 %v3981_v21  ;;  %2946 = vmatprep.subr.bf16.mxu1 %v806_v25 }
 0x1d8   : > { %2947 = vmatpush3.bf16.msra.mxu1 %v806_v25  ;;  %2934 = vmatprep.mubr.bf16.mxu1 %v3984_v24  ;;  %v4045_v25 = vld [vmem:[%s3858_s5 + $0xd8] sm:$0xff]  }
 0x1d9   : > { %v2856_v26 = vpop.f32.mrb[40].mxu0  ;;  %2948 = vmatprep.subr.bf16.mxu1 %v807_v22 }
 0x1da   : > { %v693_v27 = vpop.f32.mrb[41].mxu0 }
 0x1db   : > { %v2857_v28 = vpop.f32.mrb[42].mxu0 }
 0x1dc   : > { %v809_v30 = vpack.c.bf16 %v2857_v28, %v2856_v26  ;;  %v696_v31 = vpop.f32.mrb[43].mxu0  ;;  %2949 = vmatpush3.bf16.msra.mxu1 %v807_v22  ;;  %v4037_v22 = vld [vmem:[%s3858_s5 + $0xc8] sm:$0xff]   ;;  %v4048_v26 = vld [vmem:[%s3858_s5 + $0xe0] sm:$0xff]   ;;  %v4056_v28 = vld [vmem:[%s3858_s5 + $0xf0] sm:$0xff]  }
 0x1dd   : > { %v808_v34 = vpack.c.bf16 %v696_v31, %v693_v27  ;;  %v4053_v27 = vld [vmem:[%s3858_s5 + $0xe8] sm:$0xff]  }
 0x1df   : > { %2935 = vmatmul.mubr.bf16.gmra.mrb[24].mxu1 %v3989_v29  ;;  %2950 = vmatprep.subr.bf16.mxu1 %v808_v34 }
 0x1e0   : > { %2951 = vmatpush3.bf16.msra.mxu1 %v808_v34  ;;  %2938 = vmatprep.mubr.bf16.mxu1 %v3992_v33 }
 0x1e1   : > { %v2860_v35 = vpop.f32.mrb[44].mxu0  ;;  %2952 = vmatprep.subr.bf16.mxu1 %v809_v30 }
 0x1e2   : > { %v709_v36 = vpop.f32.mrb[45].mxu0 }
 0x1e3   : > { %v2861_v38 = vpop.f32.mrb[46].mxu0 }
 0x1e4   : > { %v811_v40 = vpack.c.bf16 %v2861_v38, %v2860_v35  ;;  %v712_v41 = vpop.f32.mrb[47].mxu0  ;;  %2953 = vmatpush3.bf16.msra.mxu1 %v809_v30  ;;  %v4061_v30 = vld [vmem:[%s3858_s5 + $0xf8] sm:$0xff]  }
 0x1e5   : > { %v810_v43 = vpack.c.bf16 %v712_v41, %v709_v36 }
 0x1e7   : > { %2939 = vmatmul.mubr.bf16.gmra.mrb[28].mxu1 %v3997_v39  ;;  %2954 = vmatprep.subr.bf16.mxu1 %v810_v43 }
 0x1e8   : > { %2955 = vmatpush3.bf16.msra.mxu1 %v810_v43  ;;  %2958 = vmatprep.mubr.bf16.mxu1 %v4000_v42 }
 0x1e9   : > { %v2864_v44 = vpop.f32.mrb[48].mxu0  ;;  %2956 = vmatprep.subr.bf16.mxu1 %v811_v40 }
 0x1ea   : > { %v725_v45 = vpop.f32.mrb[49].mxu0 }
 0x1eb   : > { %v2865_v47 = vpop.f32.mrb[50].mxu0 }
 0x1ec   : > { %v813_v49 = vpack.c.bf16 %v2865_v47, %v2864_v44  ;;  %v728_v50 = vpop.f32.mrb[51].mxu0  ;;  %2957 = vmatpush3.bf16.msra.mxu1 %v811_v40 }
 0x1ed   : > { %v812_v53 = vpack.c.bf16 %v728_v50, %v725_v45 }
 0x1ef   : > { %2959 = vmatmul.mubr.bf16.vlgmr.msra.gmra.mrb[32].mxu1 %v4005_v48  ;;  %2974 = vmatprep.subr.bf16.mxu1 %v812_v53 }
 0x1f0   : > { %2975 = vmatpush3.bf16.msra.mxu1 %v812_v53  ;;  %2962 = vmatprep.mubr.bf16.mxu1 %v4008_v52 }
 0x1f1   : > { %v2868_v54 = vpop.f32.mrb[52].mxu0  ;;  %2976 = vmatprep.subr.bf16.mxu1 %v813_v49 }
 0x1f2   : > { %v741_v55 = vpop.f32.mrb[53].mxu0 }
 0x1f3   : > { %v2869_v57 = vpop.f32.mrb[54].mxu0 }
 0x1f4   : > { %v815_v59 = vpack.c.bf16 %v2869_v57, %v2868_v54  ;;  %v744_v60 = vpop.f32.mrb[55].mxu0  ;;  %2977 = vmatpush3.bf16.msra.mxu1 %v813_v49 }
 0x1f5   : > { %v814_v63 = vpack.c.bf16 %v744_v60, %v741_v55 }
 0x1f7   : > { %2963 = vmatmul.mubr.bf16.gmra.mrb[36].mxu1 %v4013_v58  ;;  %2978 = vmatprep.subr.bf16.mxu1 %v814_v63 }
 0x1f8   : > { %2979 = vmatpush3.bf16.msra.mxu1 %v814_v63  ;;  %2966 = vmatprep.mubr.bf16.mxu1 %v4016_v62 }
 0x1f9   : > { %v2872_v1 = vpop.f32.mrb[56].mxu0  ;;  %2980 = vmatprep.subr.bf16.mxu1 %v815_v59 }
 0x1fa   : > { %v757_v2 = vpop.f32.mrb[57].mxu0 }
 0x1fb   : > { %v2873_v3 = vpop.f32.mrb[58].mxu0 }
 0x1fc   : > { %v817_v6 = vpack.c.bf16 %v2873_v3, %v2872_v1  ;;  %v760_v7 = vpop.f32.mrb[59].mxu0  ;;  %2981 = vmatpush3.bf16.msra.mxu1 %v815_v59 }
 0x1fd   : > { %v816_v10 = vpack.c.bf16 %v760_v7, %v757_v2 }
 0x1ff   : > { %2967 = vmatmul.mubr.bf16.gmra.mrb[40].mxu1 %v4021_v4  ;;  %2982 = vmatprep.subr.bf16.mxu1 %v816_v10 }
 0x200   : > { %2983 = vmatpush3.bf16.msra.mxu1 %v816_v10  ;;  %2970 = vmatprep.mubr.bf16.mxu1 %v4024_v9 }
 0x201   : > { %v2876_v11 = vpop.f32.mrb[60].mxu0  ;;  %2984 = vmatprep.subr.bf16.mxu1 %v817_v6 }
 0x202   : > { %v773_v12 = vpop.f32.mrb[61].mxu0 }
 0x203   : > { %v2877_v14 = vpop.f32.mrb[62].mxu0 }
 0x204   : > { %v819_v17 = vpack.c.bf16 %v2877_v14, %v2876_v11  ;;  %v776_v18 = vpop.f32.mrb[63].mxu0  ;;  %2985 = vmatpush3.bf16.msra.mxu1 %v817_v6 }
 0x205   : > { %v818_v20 = vpack.c.bf16 %v776_v18, %v773_v12 }
 0x207   : > { %2971 = vmatmul.mubr.bf16.gmra.mrb[44].mxu1 %v4029_v15  ;;  %2986 = vmatprep.subr.bf16.mxu1 %v818_v20 }
 0x208   : > { %2987 = vmatpush3.bf16.msra.mxu1 %v818_v20  ;;  %2990 = vmatprep.mubr.bf16.mxu1 %v4032_v19 }
 0x209   : > { %2988 = vmatprep.subr.bf16.mxu1 %v819_v17 }
 0x20c   : > { %2989 = vmatpush3.bf16.msra.mxu1 %v819_v17 }
 0x20f   : > { %2991 = vmatmul.mubr.bf16.vlgmr.msra.gmra.mrb[48].mxu1 %v4037_v22 }
 0x210   : > { %2994 = vmatprep.mubr.bf16.mxu1 %v4040_v23 }
 0x217   : > { %2995 = vmatmul.mubr.bf16.gmra.mrb[52].mxu1 %v4045_v25 }
 0x218   : > { %2998 = vmatprep.mubr.bf16.mxu1 %v4048_v26 }
 0x21f   : > { %2999 = vmatmul.mubr.bf16.gmra.mrb[56].mxu1 %v4053_v27 }
 0x220   : > { %3002 = vmatprep.mubr.bf16.mxu1 %v4056_v28 }
 0x227   : > { %3003 = vmatmul.mubr.bf16.gmra.mrb[60].mxu1 %v4061_v30 }
 0x228   : > { %3102 = vmatprep.mubr.bf16.mxu1 %v3937_v56 }
 0x282   : > { %v2896_v31 = vpop.f32.mrb[0].mxu1 }
 0x283   : > { %v1402_v34 = vmul.f32 0.2, %v2896_v31  ;;  %v902_v35 = vpop.f32.mrb[1].mxu1 }
 0x284   : > { %v1400_v36 = vmul.f32 0.2, %v902_v35  ;;  %v2897_v38 = vpop.f32.mrb[2].mxu1 }
 0x285   : > { %v1403_v40 = vmul.f32 0.2, %v2897_v38  ;;  %v905_v41 = vpop.f32.mrb[3].mxu1  ;;  %v1466_v44 = vmax.f32 %v2896_v31, %v1402_v34 }
 0x286   : > { %v1401_v43 = vmul.f32 0.2, %v905_v41  ;;  %v1464_v47 = vmax.f32 %v902_v35, %v1400_v36 }
 0x287   : > { %v1467_v45 = vmax.f32 %v2897_v38, %v1403_v40 }
 0x288   : > { %v1465_v49 = vmax.f32 %v905_v41, %v1401_v43 }
 0x289   : > { %v1529_v50 = vpack.c.bf16 %v1467_v45, %v1466_v44 }
 0x28a   : > { %v1528_v53 = vpack.c.bf16 %v1465_v49, %v1464_v47  ;;  %v2900_v54 = vpop.f32.mrb[4].mxu1 }
 0x28b   : > { %v1406_v55 = vmul.f32 0.2, %v2900_v54  ;;  %v918_v57 = vpop.f32.mrb[5].mxu1 }
 0x28c   : > { %v1404_v59 = vmul.f32 0.2, %v918_v57  ;;  %v2901_v60 = vpop.f32.mrb[6].mxu1  ;;  %3022 = vmatprep.mubr.bf16.mxu0 %v1528_v53 }
 0x28d   : > { %v1407_v56 = vmul.f32 0.2, %v2901_v60  ;;  %v921_v63 = vpop.f32.mrb[7].mxu1  ;;  %3023 = vmatmul.mubr.bf16.vlgmr.msra.gmra.mrb[64].mxu0 %v1529_v50  ;;  %v1470_v2 = vmax.f32 %v2900_v54, %v1406_v55 }
 0x28e   : > { %v1405_v1 = vmul.f32 0.2, %v921_v63  ;;  %v1468_v6 = vmax.f32 %v918_v57, %v1404_v59 }
 0x28f   : > { %v1471_v3 = vmax.f32 %v2901_v60, %v1407_v56 }
 0x290   : > { %v1469_v7 = vmax.f32 %v921_v63, %v1405_v1 }
 0x291   : > { %v1531_v10 = vpack.c.bf16 %v1471_v3, %v1470_v2 }
 0x292   : > { %v1530_v11 = vpack.c.bf16 %v1469_v7, %v1468_v6  ;;  %v2904_v12 = vpop.f32.mrb[8].mxu1 }
 0x293   : > { %v1410_v14 = vmul.f32 0.2, %v2904_v12  ;;  %v934_v17 = vpop.f32.mrb[9].mxu1 }
 0x294   : > { %v1408_v18 = vmul.f32 0.2, %v934_v17  ;;  %v2905_v20 = vpop.f32.mrb[10].mxu1  ;;  %3026 = vmatprep.mubr.bf16.mxu0 %v1530_v11 }
 0x295   : > { %v1411_v31 = vmul.f32 0.2, %v2905_v20  ;;  %v937_v34 = vpop.f32.mrb[11].mxu1  ;;  %3027 = vmatmul.mubr.bf16.gmra.mrb[68].mxu0 %v1531_v10  ;;  %v1474_v36 = vmax.f32 %v2904_v12, %v1410_v14 }
 0x296   : > { %v1409_v35 = vmul.f32 0.2, %v937_v34  ;;  %v1472_v40 = vmax.f32 %v934_v17, %v1408_v18 }
 0x297   : > { %v1475_v38 = vmax.f32 %v2905_v20, %v1411_v31 }
 0x298   : > { %v1473_v41 = vmax.f32 %v937_v34, %v1409_v35 }
 0x299   : > { %v1533_v43 = vpack.c.bf16 %v1475_v38, %v1474_v36 }
 0x29a   : > { %v1532_v44 = vpack.c.bf16 %v1473_v41, %v1472_v40  ;;  %v2908_v45 = vpop.f32.mrb[12].mxu1 }
 0x29b   : > { %v1414_v47 = vmul.f32 0.2, %v2908_v45  ;;  %v950_v49 = vpop.f32.mrb[13].mxu1 }
 0x29c   : > { %v1412_v50 = vmul.f32 0.2, %v950_v49  ;;  %v2909_v53 = vpop.f32.mrb[14].mxu1  ;;  %3030 = vmatprep.mubr.bf16.mxu0 %v1532_v44 }
 0x29d   : > { %v1415_v54 = vmul.f32 0.2, %v2909_v53  ;;  %v953_v55 = vpop.f32.mrb[15].mxu1  ;;  %3031 = vmatmul.mubr.bf16.gmra.mrb[72].mxu0 %v1533_v43  ;;  %v1478_v59 = vmax.f32 %v2908_v45, %v1414_v47 }
 0x29e   : > { %v1413_v57 = vmul.f32 0.2, %v953_v55  ;;  %v1476_v56 = vmax.f32 %v950_v49, %v1412_v50 }
 0x29f   : > { %v1479_v60 = vmax.f32 %v2909_v53, %v1415_v54 }
 0x2a0   : > { %v1477_v63 = vmax.f32 %v953_v55, %v1413_v57 }
 0x2a1   : > { %v1535_v1 = vpack.c.bf16 %v1479_v60, %v1478_v59 }
 0x2a2   : > { %v1534_v2 = vpack.c.bf16 %v1477_v63, %v1476_v56  ;;  %v2928_v3 = vpop.f32.mrb[16].mxu1 }
 0x2a3   : > { %v1418_v6 = vmul.f32 0.2, %v2928_v3  ;;  %v1047_v7 = vpop.f32.mrb[17].mxu1 }
 0x2a4   : > { %v1416_v10 = vmul.f32 0.2, %v1047_v7  ;;  %v2929_v11 = vpop.f32.mrb[18].mxu1  ;;  %3034 = vmatprep.mubr.bf16.mxu0 %v1534_v2 }
 0x2a5   : > { %v1419_v12 = vmul.f32 0.2, %v2929_v11  ;;  %v1050_v14 = vpop.f32.mrb[19].mxu1  ;;  %3035 = vmatmul.mubr.bf16.gmra.mrb[76].mxu0 %v1535_v1  ;;  %v1482_v18 = vmax.f32 %v2928_v3, %v1418_v6 }
 0x2a6   : > { %v1417_v17 = vmul.f32 0.2, %v1050_v14  ;;  %v1480_v31 = vmax.f32 %v1047_v7, %v1416_v10 }
 0x2a7   : > { %v1483_v20 = vmax.f32 %v2929_v11, %v1419_v12 }
 0x2a8   : > { %v1481_v34 = vmax.f32 %v1050_v14, %v1417_v17 }
 0x2a9   : > { %v1537_v35 = vpack.c.bf16 %v1483_v20, %v1482_v18 }
 0x2aa   : > { %v1536_v36 = vpack.c.bf16 %v1481_v34, %v1480_v31  ;;  %v2932_v38 = vpop.f32.mrb[20].mxu1 }
 0x2ab   : > { %v1422_v40 = vmul.f32 0.2, %v2932_v38  ;;  %v1063_v41 = vpop.f32.mrb[21].mxu1 }
 0x2ac   : > { %v1420_v43 = vmul.f32 0.2, %v1063_v41  ;;  %v2933_v44 = vpop.f32.mrb[22].mxu1  ;;  %3038 = vmatprep.mubr.bf16.mxu0 %v1536_v36 }
 0x2ad   : > { %v1423_v45 = vmul.f32 0.2, %v2933_v44  ;;  %v1066_v47 = vpop.f32.mrb[23].mxu1  ;;  %3039 = vmatmul.mubr.bf16.gmra.mrb[80].mxu0 %v1537_v35  ;;  %v1486_v50 = vmax.f32 %v2932_v38, %v1422_v40 }
 0x2ae   : > { %v1421_v49 = vmul.f32 0.2, %v1066_v47  ;;  %v1484_v54 = vmax.f32 %v1063_v41, %v1420_v43 }
 0x2af   : > { %v1487_v53 = vmax.f32 %v2933_v44, %v1423_v45 }
 0x2b0   : > { %v1485_v55 = vmax.f32 %v1066_v47, %v1421_v49 }
 0x2b1   : > { %v1539_v57 = vpack.c.bf16 %v1487_v53, %v1486_v50 }
 0x2b2   : > { %v1538_v59 = vpack.c.bf16 %v1485_v55, %v1484_v54  ;;  %v2936_v60 = vpop.f32.mrb[24].mxu1 }
 0x2b3   : > { %v1426_v56 = vmul.f32 0.2, %v2936_v60  ;;  %v1079_v63 = vpop.f32.mrb[25].mxu1 }
 0x2b4   : > { %v1424_v1 = vmul.f32 0.2, %v1079_v63  ;;  %v2937_v2 = vpop.f32.mrb[26].mxu1  ;;  %3042 = vmatprep.mubr.bf16.mxu0 %v1538_v59 }
 0x2b5   : > { %v1427_v3 = vmul.f32 0.2, %v2937_v2  ;;  %v1082_v6 = vpop.f32.mrb[27].mxu1  ;;  %3043 = vmatmul.mubr.bf16.gmra.mrb[84].mxu0 %v1539_v57  ;;  %v1490_v10 = vmax.f32 %v2936_v60, %v1426_v56 }
 0x2b6   : > { %v1425_v7 = vmul.f32 0.2, %v1082_v6  ;;  %v1488_v12 = vmax.f32 %v1079_v63, %v1424_v1 }
 0x2b7   : > { %v1491_v11 = vmax.f32 %v2937_v2, %v1427_v3 }
 0x2b8   : > { %v1489_v14 = vmax.f32 %v1082_v6, %v1425_v7 }
 0x2b9   : > { %v1541_v17 = vpack.c.bf16 %v1491_v11, %v1490_v10 }
 0x2ba   : > { %v1540_v18 = vpack.c.bf16 %v1489_v14, %v1488_v12  ;;  %v2940_v20 = vpop.f32.mrb[28].mxu1 }
 0x2bb   : > { %v1430_v31 = vmul.f32 0.2, %v2940_v20  ;;  %v1095_v34 = vpop.f32.mrb[29].mxu1 }
 0x2bc   : > { %v1428_v35 = vmul.f32 0.2, %v1095_v34  ;;  %v2941_v36 = vpop.f32.mrb[30].mxu1  ;;  %3046 = vmatprep.mubr.bf16.mxu0 %v1540_v18 }
 0x2bd   : > { %v1431_v38 = vmul.f32 0.2, %v2941_v36  ;;  %v1098_v40 = vpop.f32.mrb[31].mxu1  ;;  %3047 = vmatmul.mubr.bf16.gmra.mrb[88].mxu0 %v1541_v17  ;;  %v1494_v43 = vmax.f32 %v2940_v20, %v1430_v31 }
 0x2be   : > { %v1429_v41 = vmul.f32 0.2, %v1098_v40  ;;  %v1492_v45 = vmax.f32 %v1095_v34, %v1428_v35 }
 0x2bf   : > { %v1495_v44 = vmax.f32 %v2941_v36, %v1431_v38 }
 0x2c0   : > { %v1493_v47 = vmax.f32 %v1098_v40, %v1429_v41 }
 0x2c1   : > { %v1543_v49 = vpack.c.bf16 %v1495_v44, %v1494_v43 }
 0x2c2   : > { %v1542_v50 = vpack.c.bf16 %v1493_v47, %v1492_v45  ;;  %v2960_v53 = vpop.f32.mrb[32].mxu1 }
 0x2c3   : > { %v1434_v54 = vmul.f32 0.2, %v2960_v53  ;;  %v1192_v55 = vpop.f32.mrb[33].mxu1 }
 0x2c4   : > { %v1432_v57 = vmul.f32 0.2, %v1192_v55  ;;  %v2961_v59 = vpop.f32.mrb[34].mxu1  ;;  %3050 = vmatprep.mubr.bf16.mxu0 %v1542_v50 }
 0x2c5   : > { %v1435_v60 = vmul.f32 0.2, %v2961_v59  ;;  %v1195_v56 = vpop.f32.mrb[35].mxu1  ;;  %3051 = vmatmul.mubr.bf16.gmra.mrb[92].mxu0 %v1543_v49  ;;  %v1498_v1 = vmax.f32 %v2960_v53, %v1434_v54 }
 0x2c6   : > { %v1433_v63 = vmul.f32 0.2, %v1195_v56  ;;  %v1496_v3 = vmax.f32 %v1192_v55, %v1432_v57 }
 0x2c7   : > { %v1499_v2 = vmax.f32 %v2961_v59, %v1435_v60 }
 0x2c8   : > { %v1497_v6 = vmax.f32 %v1195_v56, %v1433_v63 }
 0x2c9   : > { %v1545_v7 = vpack.c.bf16 %v1499_v2, %v1498_v1 }
 0x2ca   : > { %v1544_v10 = vpack.c.bf16 %v1497_v6, %v1496_v3  ;;  %v2964_v11 = vpop.f32.mrb[36].mxu1 }
 0x2cb   : > { %v1438_v12 = vmul.f32 0.2, %v2964_v11  ;;  %v1208_v14 = vpop.f32.mrb[37].mxu1 }
 0x2cc   : > { %v1436_v17 = vmul.f32 0.2, %v1208_v14  ;;  %v2965_v18 = vpop.f32.mrb[38].mxu1  ;;  %3054 = vmatprep.mubr.bf16.mxu0 %v1544_v10 }
 0x2cd   : > { %v1439_v20 = vmul.f32 0.2, %v2965_v18  ;;  %v1211_v31 = vpop.f32.mrb[39].mxu1  ;;  %3055 = vmatmul.mubr.bf16.gmra.mrb[96].mxu0 %v1545_v7  ;;  %v1502_v35 = vmax.f32 %v2964_v11, %v1438_v12 }
 0x2ce   : > { %v1437_v34 = vmul.f32 0.2, %v1211_v31  ;;  %v1500_v38 = vmax.f32 %v1208_v14, %v1436_v17 }
 0x2cf   : > { %v1503_v36 = vmax.f32 %v2965_v18, %v1439_v20 }
 0x2d0   : > { %v1501_v40 = vmax.f32 %v1211_v31, %v1437_v34 }
 0x2d1   : > { %v1547_v41 = vpack.c.bf16 %v1503_v36, %v1502_v35 }
 0x2d2   : > { %v1546_v43 = vpack.c.bf16 %v1501_v40, %v1500_v38  ;;  %v2968_v44 = vpop.f32.mrb[40].mxu1 }
 0x2d3   : > { %v1442_v45 = vmul.f32 0.2, %v2968_v44  ;;  %v1224_v47 = vpop.f32.mrb[41].mxu1 }
 0x2d4   : > { %v1440_v49 = vmul.f32 0.2, %v1224_v47  ;;  %v2969_v50 = vpop.f32.mrb[42].mxu1  ;;  %3058 = vmatprep.mubr.bf16.mxu0 %v1546_v43 }
 0x2d5   : > { %v1443_v53 = vmul.f32 0.2, %v2969_v50  ;;  %v1227_v54 = vpop.f32.mrb[43].mxu1  ;;  %3059 = vmatmul.mubr.bf16.gmra.mrb[100].mxu0 %v1547_v41  ;;  %v1506_v57 = vmax.f32 %v2968_v44, %v1442_v45 }
 0x2d6   : > { %v1441_v55 = vmul.f32 0.2, %v1227_v54  ;;  %v1504_v60 = vmax.f32 %v1224_v47, %v1440_v49 }
 0x2d7   : > { %v1507_v59 = vmax.f32 %v2969_v50, %v1443_v53 }
 0x2d8   : > { %v1505_v56 = vmax.f32 %v1227_v54, %v1441_v55 }
 0x2d9   : > { %v1549_v63 = vpack.c.bf16 %v1507_v59, %v1506_v57 }
 0x2da   : > { %v1548_v1 = vpack.c.bf16 %v1505_v56, %v1504_v60  ;;  %v2972_v2 = vpop.f32.mrb[44].mxu1 }
 0x2db   : > { %v1446_v3 = vmul.f32 0.2, %v2972_v2  ;;  %v1240_v6 = vpop.f32.mrb[45].mxu1 }
 0x2dc   : > { %v1444_v7 = vmul.f32 0.2, %v1240_v6  ;;  %v2973_v10 = vpop.f32.mrb[46].mxu1  ;;  %3062 = vmatprep.mubr.bf16.mxu0 %v1548_v1 }
 0x2dd   : > { %v1447_v11 = vmul.f32 0.2, %v2973_v10  ;;  %v1243_v12 = vpop.f32.mrb[47].mxu1  ;;  %3063 = vmatmul.mubr.bf16.gmra.mrb[104].mxu0 %v1549_v63  ;;  %v1510_v17 = vmax.f32 %v2972_v2, %v1446_v3 }
 0x2de   : > { %v1445_v14 = vmul.f32 0.2, %v1243_v12  ;;  %v1508_v20 = vmax.f32 %v1240_v6, %v1444_v7 }
 0x2df   : > { %v1511_v18 = vmax.f32 %v2973_v10, %v1447_v11 }
 0x2e0   : > { %v1509_v31 = vmax.f32 %v1243_v12, %v1445_v14 }
 0x2e1   : > { %v1551_v34 = vpack.c.bf16 %v1511_v18, %v1510_v17 }
 0x2e2   : > { %v1550_v35 = vpack.c.bf16 %v1509_v31, %v1508_v20  ;;  %v2992_v36 = vpop.f32.mrb[48].mxu1 }
 0x2e3   : > { %v1450_v38 = vmul.f32 0.2, %v2992_v36  ;;  %v1337_v40 = vpop.f32.mrb[49].mxu1 }
 0x2e4   : > { %v1448_v41 = vmul.f32 0.2, %v1337_v40  ;;  %v2993_v43 = vpop.f32.mrb[50].mxu1  ;;  %3066 = vmatprep.mubr.bf16.mxu0 %v1550_v35 }
 0x2e5   : > { %v1451_v44 = vmul.f32 0.2, %v2993_v43  ;;  %v1340_v45 = vpop.f32.mrb[51].mxu1  ;;  %3067 = vmatmul.mubr.bf16.gmra.mrb[108].mxu0 %v1551_v34  ;;  %v1514_v49 = vmax.f32 %v2992_v36, %v1450_v38 }
 0x2e6   : > { %v1449_v47 = vmul.f32 0.2, %v1340_v45  ;;  %v1512_v53 = vmax.f32 %v1337_v40, %v1448_v41 }
 0x2e7   : > { %v1515_v50 = vmax.f32 %v2993_v43, %v1451_v44 }
 0x2e8   : > { %v1513_v54 = vmax.f32 %v1340_v45, %v1449_v47 }
 0x2e9   : > { %v1553_v55 = vpack.c.bf16 %v1515_v50, %v1514_v49 }
 0x2ea   : > { %v1552_v57 = vpack.c.bf16 %v1513_v54, %v1512_v53  ;;  %v2996_v59 = vpop.f32.mrb[52].mxu1 }
 0x2eb   : > { %v1454_v60 = vmul.f32 0.2, %v2996_v59  ;;  %v1353_v56 = vpop.f32.mrb[53].mxu1 }
 0x2ec   : > { %v1452_v63 = vmul.f32 0.2, %v1353_v56  ;;  %v2997_v1 = vpop.f32.mrb[54].mxu1  ;;  %3070 = vmatprep.mubr.bf16.mxu0 %v1552_v57 }
 0x2ed   : > { %v1455_v2 = vmul.f32 0.2, %v2997_v1  ;;  %v1356_v3 = vpop.f32.mrb[55].mxu1  ;;  %3071 = vmatmul.mubr.bf16.gmra.mrb[112].mxu0 %v1553_v55  ;;  %v1518_v7 = vmax.f32 %v2996_v59, %v1454_v60 }
 0x2ee   : > { %v1453_v6 = vmul.f32 0.2, %v1356_v3  ;;  %v1516_v11 = vmax.f32 %v1353_v56, %v1452_v63 }
 0x2ef   : > { %v1519_v10 = vmax.f32 %v2997_v1, %v1455_v2 }
 0x2f0   : > { %v1517_v12 = vmax.f32 %v1356_v3, %v1453_v6 }
 0x2f1   : > { %v1555_v14 = vpack.c.bf16 %v1519_v10, %v1518_v7 }
 0x2f2   : > { %v1554_v17 = vpack.c.bf16 %v1517_v12, %v1516_v11  ;;  %v3000_v18 = vpop.f32.mrb[56].mxu1 }
 0x2f3   : > { %v1458_v20 = vmul.f32 0.2, %v3000_v18  ;;  %v1369_v31 = vpop.f32.mrb[57].mxu1 }
 0x2f4   : > { %v1456_v34 = vmul.f32 0.2, %v1369_v31  ;;  %v3001_v35 = vpop.f32.mrb[58].mxu1  ;;  %3074 = vmatprep.mubr.bf16.mxu0 %v1554_v17 }
 0x2f5   : > { %v1459_v36 = vmul.f32 0.2, %v3001_v35  ;;  %v1372_v38 = vpop.f32.mrb[59].mxu1  ;;  %3075 = vmatmul.mubr.bf16.gmra.mrb[116].mxu0 %v1555_v14  ;;  %v1522_v41 = vmax.f32 %v3000_v18, %v1458_v20 }
 0x2f6   : > { %v1457_v40 = vmul.f32 0.2, %v1372_v38  ;;  %v1520_v44 = vmax.f32 %v1369_v31, %v1456_v34 }
 0x2f7   : > { %v1523_v43 = vmax.f32 %v3001_v35, %v1459_v36 }
 0x2f8   : > { %v1521_v45 = vmax.f32 %v1372_v38, %v1457_v40 }
 0x2f9   : > { %v1557_v47 = vpack.c.bf16 %v1523_v43, %v1522_v41 }
 0x2fa   : > { %v1556_v49 = vpack.c.bf16 %v1521_v45, %v1520_v44  ;;  %v3004_v50 = vpop.f32.mrb[60].mxu1 }
 0x2fb   : > { %v1462_v53 = vmul.f32 0.2, %v3004_v50  ;;  %v1385_v54 = vpop.f32.mrb[61].mxu1 }
 0x2fc   : > { %v1460_v55 = vmul.f32 0.2, %v1385_v54  ;;  %v3005_v57 = vpop.f32.mrb[62].mxu1  ;;  %3078 = vmatprep.mubr.bf16.mxu0 %v1556_v49 }
 0x2fd   : > { %v1463_v59 = vmul.f32 0.2, %v3005_v57  ;;  %v1388_v60 = vpop.f32.mrb[63].mxu1  ;;  %3079 = vmatmul.mubr.bf16.gmra.mrb[120].mxu0 %v1557_v47  ;;  %v1526_v63 = vmax.f32 %v3004_v50, %v1462_v53 }
 0x2fe   : > { %v1461_v56 = vmul.f32 0.2, %v1388_v60  ;;  %v1524_v2 = vmax.f32 %v1385_v54, %v1460_v55 }
 0x2ff   : > { %v1527_v1 = vmax.f32 %v3005_v57, %v1463_v59 }
 0x300   : > { %v1525_v3 = vmax.f32 %v1388_v60, %v1461_v56 }
 0x301   : > { %v1559_v6 = vpack.c.bf16 %v1527_v1, %v1526_v63 }
 0x302   : > { %v1558_v7 = vpack.c.bf16 %v1525_v3, %v1524_v2 }
 0x304   : > { %3082 = vmatprep.mubr.bf16.mxu0 %v1558_v7 }
 0x305   : > { %3083 = vmatmul.mubr.bf16.gmra.mrb[124].mxu0 %v1559_v6 }
 0x360   : > { %v3024_v10 = vpop.f32.mrb[64].mxu0 }
 0x361   : > { %v1594_v11 = vpop.f32.mrb[65].mxu0 }
 0x362   : > { %v3025_v12 = vpop.f32.mrb[66].mxu0 }
 0x363   : > { %v1850_v14 = vpack.c.bf16 %v3025_v12, %v3024_v10  ;;  %v1597_v17 = vpop.f32.mrb[67].mxu0 }
 0x364   : > { %v1849_v18 = vpack.c.bf16 %v1597_v17, %v1594_v11 }
 0x366   : > { %3086 = vmatprep.subr.bf16.mxu1 %v1849_v18 }
 0x367   : > { %3087 = vmatpush3.bf16.msra.mxu1 %v1849_v18 }
 0x368   : > { %v3028_v20 = vpop.f32.mrb[68].mxu0  ;;  %3088 = vmatprep.subr.bf16.mxu1 %v1850_v14 }
 0x369   : > { %v1610_v31 = vpop.f32.mrb[69].mxu0 }
 0x36a   : > { %v3029_v34 = vpop.f32.mrb[70].mxu0 }
 0x36b   : > { %v1852_v35 = vpack.c.bf16 %v3029_v34, %v3028_v20  ;;  %v1613_v36 = vpop.f32.mrb[71].mxu0  ;;  %3089 = vmatpush3.bf16.msra.mxu1 %v1850_v14 }
 0x36c   : > { %v1851_v38 = vpack.c.bf16 %v1613_v36, %v1610_v31 }
 0x36e   : > { %3090 = vmatprep.subr.bf16.mxu1 %v1851_v38 }
 0x36f   : > { %3091 = vmatpush3.bf16.msra.mxu1 %v1851_v38 }
 0x370   : > { %v3032_v40 = vpop.f32.mrb[72].mxu0  ;;  %3092 = vmatprep.subr.bf16.mxu1 %v1852_v35 }
 0x371   : > { %v1626_v41 = vpop.f32.mrb[73].mxu0 }
 0x372   : > { %v3033_v43 = vpop.f32.mrb[74].mxu0 }
 0x373   : > { %v1854_v44 = vpack.c.bf16 %v3033_v43, %v3032_v40  ;;  %v1629_v45 = vpop.f32.mrb[75].mxu0  ;;  %3093 = vmatpush3.bf16.msra.mxu1 %v1852_v35 }
 0x374   : > { %v1853_v47 = vpack.c.bf16 %v1629_v45, %v1626_v41 }
 0x376   : > { %3094 = vmatprep.subr.bf16.mxu1 %v1853_v47 }
 0x377   : > { %3095 = vmatpush3.bf16.msra.mxu1 %v1853_v47 }
 0x378   : > { %v3036_v49 = vpop.f32.mrb[76].mxu0  ;;  %3096 = vmatprep.subr.bf16.mxu1 %v1854_v44 }
 0x379   : > { %v1642_v50 = vpop.f32.mrb[77].mxu0 }
 0x37a   : > { %v3037_v53 = vpop.f32.mrb[78].mxu0 }
 0x37b   : > { %v1856_v54 = vpack.c.bf16 %v3037_v53, %v3036_v49  ;;  %v1645_v55 = vpop.f32.mrb[79].mxu0  ;;  %3097 = vmatpush3.bf16.msra.mxu1 %v1854_v44 }
 0x37c   : > { %v1855_v57 = vpack.c.bf16 %v1645_v55, %v1642_v50 }
 0x37e   : > { %3098 = vmatprep.subr.bf16.mxu1 %v1855_v57 }
 0x37f   : > { %3099 = vmatpush3.bf16.msra.mxu1 %v1855_v57 }
 0x380   : > { %v3040_v59 = vpop.f32.mrb[80].mxu0  ;;  %3100 = vmatprep.subr.bf16.mxu1 %v1856_v54 }
 0x381   : > { %v1658_v60 = vpop.f32.mrb[81].mxu0 }
 0x382   : > { %v3041_v56 = vpop.f32.mrb[82].mxu0 }
 0x383   : > { %v1858_v63 = vpack.c.bf16 %v3041_v56, %v3040_v59  ;;  %v1661_v1 = vpop.f32.mrb[83].mxu0  ;;  %3101 = vmatpush3.bf16.msra.mxu1 %v1856_v54 }
 0x384   : > { %v1857_v2 = vpack.c.bf16 %v1661_v1, %v1658_v60 }
 0x386   : > { %3103 = vmatmul.mubr.bf16.vlgmr.msra.gmra.mrb[64].mxu1 %v3941_v32  ;;  %3118 = vmatprep.subr.bf16.mxu1 %v1857_v2 }
 0x387   : > { %3119 = vmatpush3.bf16.msra.mxu1 %v1857_v2  ;;  %3106 = vmatprep.mubr.bf16.mxu1 %v3944_v37 }
 0x388   : > { %v3044_v3 = vpop.f32.mrb[84].mxu0  ;;  %3120 = vmatprep.subr.bf16.mxu1 %v1858_v63 }
 0x389   : > { %v1674_v6 = vpop.f32.mrb[85].mxu0 }
 0x38a   : > { %v3045_v7 = vpop.f32.mrb[86].mxu0 }
 0x38b   : > { %v1860_v10 = vpack.c.bf16 %v3045_v7, %v3044_v3  ;;  %v1677_v11 = vpop.f32.mrb[87].mxu0  ;;  %3121 = vmatpush3.bf16.msra.mxu1 %v1858_v63 }
 0x38c   : > { %v1859_v12 = vpack.c.bf16 %v1677_v11, %v1674_v6 }
 0x38e   : > { %3107 = vmatmul.mubr.bf16.gmra.mrb[68].mxu1 %v3949_v46  ;;  %3122 = vmatprep.subr.bf16.mxu1 %v1859_v12 }
 0x38f   : > { %3123 = vmatpush3.bf16.msra.mxu1 %v1859_v12  ;;  %3110 = vmatprep.mubr.bf16.mxu1 %v3952_v51 }
 0x390   : > { %v3048_v14 = vpop.f32.mrb[88].mxu0  ;;  %3124 = vmatprep.subr.bf16.mxu1 %v1860_v10 }
 0x391   : > { %v1690_v32 = vpop.f32.mrb[89].mxu0 }
 0x392   : > { %v3049_v17 = vpop.f32.mrb[90].mxu0 }
 0x393   : > { %v1862_v18 = vpack.c.bf16 %v3049_v17, %v3048_v14  ;;  %v1693_v37 = vpop.f32.mrb[91].mxu0  ;;  %3125 = vmatpush3.bf16.msra.mxu1 %v1860_v10 }
 0x394   : > { %v1861_v20 = vpack.c.bf16 %v1693_v37, %v1690_v32 }
 0x396   : > { %3111 = vmatmul.mubr.bf16.gmra.mrb[72].mxu1 %v3957_v61  ;;  %3126 = vmatprep.subr.bf16.mxu1 %v1861_v20 }
 0x397   : > { %3127 = vmatpush3.bf16.msra.mxu1 %v1861_v20  ;;  %3114 = vmatprep.mubr.bf16.mxu1 %v3960_v0 }
 0x398   : > { %v3052_v31 = vpop.f32.mrb[92].mxu0  ;;  %3128 = vmatprep.subr.bf16.mxu1 %v1862_v18 }
 0x399   : > { %v1706_v46 = vpop.f32.mrb[93].mxu0 }
 0x39a   : > { %v3053_v34 = vpop.f32.mrb[94].mxu0 }
 0x39b   : > { %v1864_v35 = vpack.c.bf16 %v3053_v34, %v3052_v31  ;;  %v1709_v51 = vpop.f32.mrb[95].mxu0  ;;  %3129 = vmatpush3.bf16.msra.mxu1 %v1862_v18 }
 0x39c   : > { %v1863_v36 = vpack.c.bf16 %v1709_v51, %v1706_v46 }
 0x39e   : > { %3115 = vmatmul.mubr.bf16.gmra.mrb[76].mxu1 %v3965_v5  ;;  %3130 = vmatprep.subr.bf16.mxu1 %v1863_v36 }
 0x39f   : > { %3131 = vmatpush3.bf16.msra.mxu1 %v1863_v36  ;;  %3134 = vmatprep.mubr.bf16.mxu1 %v3968_v8 }
 0x3a0   : > { %v3056_v38 = vpop.f32.mrb[96].mxu0  ;;  %3132 = vmatprep.subr.bf16.mxu1 %v1864_v35 }
 0x3a1   : > { %v1722_v61 = vpop.f32.mrb[97].mxu0 }
 0x3a2   : > { %v3057_v40 = vpop.f32.mrb[98].mxu0 }
 0x3a3   : > { %v1866_v41 = vpack.c.bf16 %v3057_v40, %v3056_v38  ;;  %v1725_v0 = vpop.f32.mrb[99].mxu0  ;;  %3133 = vmatpush3.bf16.msra.mxu1 %v1864_v35  ;;  %v3328_v35 = vld [vmem:[%s3850_s12 + $0x30] sm:$0xff]  ;;  %v3329_v38 = vld [vmem:[%s3850_s12 + $0x20] sm:$0xff] }
 0x3a4   : > { %v1865_v43 = vpack.c.bf16 %v1725_v0, %v1722_v61 }
 0x3a6   : > { %3135 = vmatmul.mubr.bf16.vlgmr.msra.gmra.mrb[80].mxu1 %v3973_v13  ;;  %3150 = vmatprep.subr.bf16.mxu1 %v1865_v43 }
 0x3a7   : > { %3151 = vmatpush3.bf16.msra.mxu1 %v1865_v43  ;;  %3138 = vmatprep.mubr.bf16.mxu1 %v3976_v16 }
 0x3a8   : > { %v3060_v44 = vpop.f32.mrb[100].mxu0  ;;  %3152 = vmatprep.subr.bf16.mxu1 %v1866_v41 }
 0x3a9   : > { %v1738_v5 = vpop.f32.mrb[101].mxu0 }
 0x3aa   : > { %v3061_v45 = vpop.f32.mrb[102].mxu0 }
 0x3ab   : > { %v1868_v47 = vpack.c.bf16 %v3061_v45, %v3060_v44  ;;  %v1741_v8 = vpop.f32.mrb[103].mxu0  ;;  %3153 = vmatpush3.bf16.msra.mxu1 %v1866_v41  ;;  %v3330_v41 = vld [vmem:[%s3850_s12 + $0x38] sm:$0xff]  ;;  %v3331_v44 = vld [vmem:[%s3850_s12 + $0x28] sm:$0xff] }
 0x3ac   : > { %v1867_v49 = vpack.c.bf16 %v1741_v8, %v1738_v5 }
 0x3ae   : > { %3139 = vmatmul.mubr.bf16.gmra.mrb[84].mxu1 %v3981_v21  ;;  %3154 = vmatprep.subr.bf16.mxu1 %v1867_v49 }
 0x3af   : > { %3155 = vmatpush3.bf16.msra.mxu1 %v1867_v49  ;;  %3142 = vmatprep.mubr.bf16.mxu1 %v3984_v24 }
 0x3b0   : > { %v3064_v50 = vpop.f32.mrb[104].mxu0  ;;  %3156 = vmatprep.subr.bf16.mxu1 %v1868_v47 }
 0x3b1   : > { %v1754_v13 = vpop.f32.mrb[105].mxu0 }
 0x3b2   : > { %v3065_v53 = vpop.f32.mrb[106].mxu0 }
 0x3b3   : > { %v1870_v54 = vpack.c.bf16 %v3065_v53, %v3064_v50  ;;  %v1757_v16 = vpop.f32.mrb[107].mxu0  ;;  %3157 = vmatpush3.bf16.msra.mxu1 %v1868_v47  ;;  %v3332_v47 = vld [vmem:[%s3850_s12 + $0x50] sm:$0xff]  ;;  %v3333_v50 = vld [vmem:[%s3850_s12 + $0x40] sm:$0xff] }
 0x3b4   : > { %v1869_v55 = vpack.c.bf16 %v1757_v16, %v1754_v13 }
 0x3b6   : > { %3143 = vmatmul.mubr.bf16.gmra.mrb[88].mxu1 %v3989_v29  ;;  %3158 = vmatprep.subr.bf16.mxu1 %v1869_v55 }
 0x3b7   : > { %3159 = vmatpush3.bf16.msra.mxu1 %v1869_v55  ;;  %3146 = vmatprep.mubr.bf16.mxu1 %v3992_v33 }
 0x3b8   : > { %v3068_v57 = vpop.f32.mrb[108].mxu0  ;;  %3160 = vmatprep.subr.bf16.mxu1 %v1870_v54 }
 0x3b9   : > { %v1770_v21 = vpop.f32.mrb[109].mxu0 }
 0x3ba   : > { %v3069_v59 = vpop.f32.mrb[110].mxu0 }
 0x3bb   : > { %v1872_v60 = vpack.c.bf16 %v3069_v59, %v3068_v57  ;;  %v1773_v24 = vpop.f32.mrb[111].mxu0  ;;  %3161 = vmatpush3.bf16.msra.mxu1 %v1870_v54  ;;  %v3334_v54 = vld [vmem:[%s3850_s12 + $0x58] sm:$0xff]  ;;  %v3335_v57 = vld [vmem:[%s3850_s12 + $0x48] sm:$0xff] }
 0x3bc   : > { %v1871_v56 = vpack.c.bf16 %v1773_v24, %v1770_v21 }
 0x3be   : > { %3147 = vmatmul.mubr.bf16.gmra.mrb[92].mxu1 %v3997_v39  ;;  %3162 = vmatprep.subr.bf16.mxu1 %v1871_v56 }
 0x3bf   : > { %3163 = vmatpush3.bf16.msra.mxu1 %v1871_v56  ;;  %3166 = vmatprep.mubr.bf16.mxu1 %v4000_v42 }
 0x3c0   : > { %v3072_v63 = vpop.f32.mrb[112].mxu0  ;;  %3164 = vmatprep.subr.bf16.mxu1 %v1872_v60 }
 0x3c1   : > { %v1786_v29 = vpop.f32.mrb[113].mxu0 }
 0x3c2   : > { %v3073_v1 = vpop.f32.mrb[114].mxu0 }
 0x3c3   : > { %v1874_v2 = vpack.c.bf16 %v3073_v1, %v3072_v63  ;;  %v1789_v33 = vpop.f32.mrb[115].mxu0  ;;  %3165 = vmatpush3.bf16.msra.mxu1 %v1872_v60  ;;  %v3336_v60 = vld [vmem:[%s3850_s12 + $0x70] sm:$0xff]  ;;  %v3337_v63 = vld [vmem:[%s3850_s12 + $0x60] sm:$0xff] }
 0x3c4   : > { %v1873_v3 = vpack.c.bf16 %v1789_v33, %v1786_v29 }
 0x3c6   : > { %3167 = vmatmul.mubr.bf16.vlgmr.msra.gmra.mrb[96].mxu1 %v4005_v48  ;;  %3182 = vmatprep.subr.bf16.mxu1 %v1873_v3 }
 0x3c7   : > { %3183 = vmatpush3.bf16.msra.mxu1 %v1873_v3  ;;  %3170 = vmatprep.mubr.bf16.mxu1 %v4008_v52 }
 0x3c8   : > { %v3076_v6 = vpop.f32.mrb[116].mxu0  ;;  %3184 = vmatprep.subr.bf16.mxu1 %v1874_v2 }
 0x3c9   : > { %v1802_v39 = vpop.f32.mrb[117].mxu0 }
 0x3ca   : > { %v3077_v7 = vpop.f32.mrb[118].mxu0 }
 0x3cb   : > { %v1876_v10 = vpack.c.bf16 %v3077_v7, %v3076_v6  ;;  %v1805_v42 = vpop.f32.mrb[119].mxu0  ;;  %3185 = vmatpush3.bf16.msra.mxu1 %v1874_v2  ;;  %v3338_v2 = vld [vmem:[%s3850_s12 + $0x78] sm:$0xff]  ;;  %v3339_v6 = vld [vmem:[%s3850_s12 + $0x68] sm:$0xff] }
 0x3cc   : > { %v1875_v11 = vpack.c.bf16 %v1805_v42, %v1802_v39 }
 0x3ce   : > { %3171 = vmatmul.mubr.bf16.gmra.mrb[100].mxu1 %v4013_v58  ;;  %3186 = vmatprep.subr.bf16.mxu1 %v1875_v11 }
 0x3cf   : > { %3187 = vmatpush3.bf16.msra.mxu1 %v1875_v11  ;;  %3174 = vmatprep.mubr.bf16.mxu1 %v4016_v62 }
 0x3d0   : > { %v3080_v12 = vpop.f32.mrb[120].mxu0  ;;  %3188 = vmatprep.subr.bf16.mxu1 %v1876_v10 }
 0x3d1   : > { %v1818_v48 = vpop.f32.mrb[121].mxu0 }
 0x3d2   : > { %v3081_v14 = vpop.f32.mrb[122].mxu0 }
 0x3d3   : > { %v1878_v32 = vpack.c.bf16 %v3081_v14, %v3080_v12  ;;  %v1821_v52 = vpop.f32.mrb[123].mxu0  ;;  %3189 = vmatpush3.bf16.msra.mxu1 %v1876_v10  ;;  %v3340_v10 = vld [vmem:[%s3850_s12 + $0x90] sm:$0xff]  ;;  %v3341_v12 = vld [vmem:[%s3850_s12 + $0x80] sm:$0xff] }
 0x3d4   : > { %v1877_v17 = vpack.c.bf16 %v1821_v52, %v1818_v48 }
 0x3d6   : > { %3175 = vmatmul.mubr.bf16.gmra.mrb[104].mxu1 %v4021_v4  ;;  %3190 = vmatprep.subr.bf16.mxu1 %v1877_v17 }
 0x3d7   : > { %3191 = vmatpush3.bf16.msra.mxu1 %v1877_v17  ;;  %3178 = vmatprep.mubr.bf16.mxu1 %v4024_v9  ;;  %v3324_v9 = vld [vmem:[%s3850_s12 + $0x10] sm:$0xff] }
 0x3d8   : > { %v3084_v18 = vpop.f32.mrb[124].mxu0  ;;  %3192 = vmatprep.subr.bf16.mxu1 %v1878_v32 }
 0x3d9   : > { %v1834_v58 = vpop.f32.mrb[125].mxu0 }
 0x3da   : > { %v3085_v37 = vpop.f32.mrb[126].mxu0 }
 0x3db   : > { %v1880_v20 = vpack.c.bf16 %v3085_v37, %v3084_v18  ;;  %v1837_v62 = vpop.f32.mrb[127].mxu0  ;;  %3193 = vmatpush3.bf16.msra.mxu1 %v1878_v32  ;;  %v3342_v32 = vld [vmem:[%s3850_s12 + $0x98] sm:$0xff]  ;;  %v3343_v18 = vld [vmem:[%s3850_s12 + $0x88] sm:$0xff] }
 0x3dc   : > { %v1879_v31 = vpack.c.bf16 %v1837_v62, %v1834_v58 }
 0x3de   : > { %3179 = vmatmul.mubr.bf16.gmra.mrb[108].mxu1 %v4029_v15  ;;  %3194 = vmatprep.subr.bf16.mxu1 %v1879_v31 }
 0x3df   : > { %3195 = vmatpush3.bf16.msra.mxu1 %v1879_v31  ;;  %3198 = vmatprep.mubr.bf16.mxu1 %v4032_v19 }
 0x3e0   : > { %3196 = vmatprep.subr.bf16.mxu1 %v1880_v20 }
 0x3e3   : > { %3197 = vmatpush3.bf16.msra.mxu1 %v1880_v20  ;;  %v3344_v20 = vld [vmem:[%s3850_s12 + $0xb0] sm:$0xff] }
 0x3e6   : > { %3199 = vmatmul.mubr.bf16.vlgmr.msra.gmra.mrb[112].mxu1 %v4037_v22  ;;  %v3325_v22 = vld [vmem:[%s3850_s12] sm:$0xff] }
 0x3e7   : > { %3202 = vmatprep.mubr.bf16.mxu1 %v4040_v23 }
 0x3ee   : > { %3203 = vmatmul.mubr.bf16.gmra.mrb[116].mxu1 %v4045_v25  ;;  %v3326_v25 = vld [vmem:[%s3850_s12 + $0x18] sm:$0xff] }
 0x3ef   : > { %3206 = vmatprep.mubr.bf16.mxu1 %v4048_v26 }
 0x3f6   : > { %3207 = vmatmul.mubr.bf16.gmra.mrb[120].mxu1 %v4053_v27 }
 0x3f7   : > { %3210 = vmatprep.mubr.bf16.mxu1 %v4056_v28  ;;  %v3327_v28 = vld [vmem:[%s3850_s12 + $0x8] sm:$0xff] }
 0x3fe   : > { %3211 = vmatmul.mubr.bf16.gmra.mrb[124].mxu1 %v4061_v30 }
 0x459   : > { %v3104_v4 = vpop.f32.mrb[64].mxu1 }
 0x45a   : > { %v2271_v15 = vadd.f32 %v3324_v9, %v3104_v4  ;;  %v1915_v19 = vpop.f32.mrb[65].mxu1  ;;  %v3345_v4 = vld [vmem:[%s3850_s12 + $0xa0] sm:$0xff] }
 0x45b   : > { %v2269_v46 = vadd.f32 %v3325_v22, %v1915_v19  ;;  %v3105_v23 = vpop.f32.mrb[66].mxu1  ;;  %v3346_v19 = vld [vmem:[%s3850_s12 + $0xb8] sm:$0xff] }
 0x45c   : > { %2335 = vst [vmem:[%s4100_s21 + $0x10] sm:$0xff] %v2271_v15  ;;  %v2272_v26 = vadd.f32 %v3326_v25, %v3105_v23  ;;  %v1918_v27 = vpop.f32.mrb[67].mxu1  ;;  %v3347_v23 = vld [vmem:[%s3850_s12 + $0xa8] sm:$0xff] }
 0x45d   : > { %2333 = vst [vmem:[%s4100_s21] sm:$0xff] %v2269_v46  ;;  %v2270_v30 = vadd.f32 %v3327_v28, %v1918_v27  ;;  %v3348_v27 = vld [vmem:[%s3850_s12 + $0xd0] sm:$0xff] }
 0x45e   : > { %2336 = vst [vmem:[%s4100_s21 + $0x18] sm:$0xff] %v2272_v26 }
 0x45f   : > { %2334 = vst [vmem:[%s4100_s21 + $0x8] sm:$0xff] %v2270_v30 }
 0x461   : > { %v3108_v34 = vpop.f32.mrb[68].mxu1 }
 0x462   : > { %v2275_v51 = vadd.f32 %v3328_v35, %v3108_v34  ;;  %v1931_v36 = vpop.f32.mrb[69].mxu1  ;;  %v3349_v34 = vld [vmem:[%s3850_s12 + $0xc0] sm:$0xff] }
 0x463   : > { %v2273_v61 = vadd.f32 %v3329_v38, %v1931_v36  ;;  %v3109_v40 = vpop.f32.mrb[70].mxu1  ;;  %v3350_v36 = vld [vmem:[%s3850_s12 + $0xd8] sm:$0xff] }
 0x464   : > { %2339 = vst [vmem:[%s4100_s21 + $0x30] sm:$0xff] %v2275_v51  ;;  %v2276_v0 = vadd.f32 %v3330_v41, %v3109_v40  ;;  %v1934_v43 = vpop.f32.mrb[71].mxu1  ;;  %v3351_v40 = vld [vmem:[%s3850_s12 + $0xc8] sm:$0xff] }
 0x465   : > { %2337 = vst [vmem:[%s4100_s21 + $0x20] sm:$0xff] %v2273_v61  ;;  %v2274_v5 = vadd.f32 %v3331_v44, %v1934_v43  ;;  %v3352_v43 = vld [vmem:[%s3850_s12 + $0xf0] sm:$0xff] }
 0x466   : > { %2340 = vst [vmem:[%s4100_s21 + $0x38] sm:$0xff] %v2276_v0 }
 0x467   : > { %2338 = vst [vmem:[%s4100_s21 + $0x28] sm:$0xff] %v2274_v5 }
 0x469   : > { %v3112_v45 = vpop.f32.mrb[72].mxu1 }
 0x46a   : > { %v2279_v8 = vadd.f32 %v3332_v47, %v3112_v45  ;;  %v1947_v49 = vpop.f32.mrb[73].mxu1  ;;  %v3353_v45 = vld [vmem:[%s3850_s12 + $0xe0] sm:$0xff] }
 0x46b   : > { %v2277_v13 = vadd.f32 %v3333_v50, %v1947_v49  ;;  %v3113_v53 = vpop.f32.mrb[74].mxu1  ;;  %v3354_v49 = vld [vmem:[%s3850_s12 + $0xf8] sm:$0xff] }
 0x46c   : > { %2343 = vst [vmem:[%s4100_s21 + $0x50] sm:$0xff] %v2279_v8  ;;  %v2280_v16 = vadd.f32 %v3334_v54, %v3113_v53  ;;  %v1950_v55 = vpop.f32.mrb[75].mxu1  ;;  %v3355_v53 = vld [vmem:[%s3850_s12 + $0xe8] sm:$0xff] }
 0x46d   : > { %2341 = vst [vmem:[%s4100_s21 + $0x40] sm:$0xff] %v2277_v13  ;;  %v2278_v21 = vadd.f32 %v3335_v57, %v1950_v55  ;;  %v3356_v55 = vld [vmem:[%s3850_s12 + $0x110] sm:$0xff] }
 0x46e   : > { %2344 = vst [vmem:[%s4100_s21 + $0x58] sm:$0xff] %v2280_v16 }
 0x46f   : > { %2342 = vst [vmem:[%s4100_s21 + $0x48] sm:$0xff] %v2278_v21 }
 0x471   : > { %v3116_v59 = vpop.f32.mrb[76].mxu1 }
 0x472   : > { %v2283_v24 = vadd.f32 %v3336_v60, %v3116_v59  ;;  %v1963_v56 = vpop.f32.mrb[77].mxu1  ;;  %v3357_v59 = vld [vmem:[%s3850_s12 + $0x100] sm:$0xff] }
 0x473   : > { %v2281_v29 = vadd.f32 %v3337_v63, %v1963_v56  ;;  %v3117_v1 = vpop.f32.mrb[78].mxu1  ;;  %v3358_v56 = vld [vmem:[%s3850_s12 + $0x118] sm:$0xff] }
 0x474   : > { %2347 = vst [vmem:[%s4100_s21 + $0x70] sm:$0xff] %v2283_v24  ;;  %v2284_v33 = vadd.f32 %v3338_v2, %v3117_v1  ;;  %v1966_v3 = vpop.f32.mrb[79].mxu1  ;;  %v3359_v1 = vld [vmem:[%s3850_s12 + $0x108] sm:$0xff] }
 0x475   : > { %2345 = vst [vmem:[%s4100_s21 + $0x60] sm:$0xff] %v2281_v29  ;;  %v2282_v39 = vadd.f32 %v3339_v6, %v1966_v3  ;;  %v3360_v3 = vld [vmem:[%s3850_s12 + $0x130] sm:$0xff] }
 0x476   : > { %2348 = vst [vmem:[%s4100_s21 + $0x78] sm:$0xff] %v2284_v33 }
 0x477   : > { %2346 = vst [vmem:[%s4100_s21 + $0x68] sm:$0xff] %v2282_v39 }
 0x479   : > { %v3136_v7 = vpop.f32.mrb[80].mxu1 }
 0x47a   : > { %v2287_v42 = vadd.f32 %v3340_v10, %v3136_v7  ;;  %v2012_v11 = vpop.f32.mrb[81].mxu1  ;;  %v3361_v7 = vld [vmem:[%s3850_s12 + $0x120] sm:$0xff] }
 0x47b   : > { %v2285_v48 = vadd.f32 %v3341_v12, %v2012_v11  ;;  %v3137_v14 = vpop.f32.mrb[82].mxu1  ;;  %v3362_v11 = vld [vmem:[%s3850_s12 + $0x138] sm:$0xff] }
 0x47c   : > { %2351 = vst [vmem:[%s4100_s21 + $0x90] sm:$0xff] %v2287_v42  ;;  %v2288_v52 = vadd.f32 %v3342_v32, %v3137_v14  ;;  %v2015_v17 = vpop.f32.mrb[83].mxu1  ;;  %v3363_v14 = vld [vmem:[%s3850_s12 + $0x128] sm:$0xff] }
 0x47d   : > { %2349 = vst [vmem:[%s4100_s21 + $0x80] sm:$0xff] %v2285_v48  ;;  %v2286_v58 = vadd.f32 %v3343_v18, %v2015_v17  ;;  %v3364_v17 = vld [vmem:[%s3850_s12 + $0x150] sm:$0xff] }
 0x47e   : > { %2352 = vst [vmem:[%s4100_s21 + $0x98] sm:$0xff] %v2288_v52 }
 0x47f   : > { %2350 = vst [vmem:[%s4100_s21 + $0x88] sm:$0xff] %v2286_v58 }
 0x481   : > { %v3140_v37 = vpop.f32.mrb[84].mxu1 }
 0x482   : > { %v2291_v62 = vadd.f32 %v3344_v20, %v3140_v37  ;;  %v2028_v31 = vpop.f32.mrb[85].mxu1  ;;  %v3365_v37 = vld [vmem:[%s3850_s12 + $0x140] sm:$0xff] }
 0x483   : > { %v2289_v9 = vadd.f32 %v3345_v4, %v2028_v31  ;;  %v3141_v15 = vpop.f32.mrb[86].mxu1  ;;  %v3366_v31 = vld [vmem:[%s3850_s12 + $0x158] sm:$0xff] }
 0x484   : > { %2355 = vst [vmem:[%s4100_s21 + $0xb0] sm:$0xff] %v2291_v62  ;;  %v2292_v22 = vadd.f32 %v3346_v19, %v3141_v15  ;;  %v2031_v46 = vpop.f32.mrb[87].mxu1  ;;  %v3367_v15 = vld [vmem:[%s3850_s12 + $0x148] sm:$0xff] }
 0x485   : > { %2353 = vst [vmem:[%s4100_s21 + $0xa0] sm:$0xff] %v2289_v9  ;;  %v2290_v25 = vadd.f32 %v3347_v23, %v2031_v46  ;;  %v3368_v46 = vld [vmem:[%s3850_s12 + $0x170] sm:$0xff] }
 0x486   : > { %2356 = vst [vmem:[%s4100_s21 + $0xb8] sm:$0xff] %v2292_v22 }
 0x487   : > { %2354 = vst [vmem:[%s4100_s21 + $0xa8] sm:$0xff] %v2290_v25 }
 0x489   : > { %v3144_v26 = vpop.f32.mrb[88].mxu1 }
 0x48a   : > { %v2295_v28 = vadd.f32 %v3348_v27, %v3144_v26  ;;  %v2044_v30 = vpop.f32.mrb[89].mxu1  ;;  %v3369_v26 = vld [vmem:[%s3850_s12 + $0x160] sm:$0xff] }
 0x48b   : > { %v2293_v35 = vadd.f32 %v3349_v34, %v2044_v30  ;;  %v3145_v51 = vpop.f32.mrb[90].mxu1  ;;  %v3370_v30 = vld [vmem:[%s3850_s12 + $0x178] sm:$0xff] }
 0x48c   : > { %2359 = vst [vmem:[%s4100_s21 + $0xd0] sm:$0xff] %v2295_v28  ;;  %v2296_v38 = vadd.f32 %v3350_v36, %v3145_v51  ;;  %v2047_v61 = vpop.f32.mrb[91].mxu1  ;;  %v3371_v51 = vld [vmem:[%s3850_s12 + $0x168] sm:$0xff] }
 0x48d   : > { %2357 = vst [vmem:[%s4100_s21 + $0xc0] sm:$0xff] %v2293_v35  ;;  %v2294_v41 = vadd.f32 %v3351_v40, %v2047_v61  ;;  %v3372_v61 = vld [vmem:[%s3850_s12 + $0x190] sm:$0xff] }
 0x48e   : > { %2360 = vst [vmem:[%s4100_s21 + $0xd8] sm:$0xff] %v2296_v38 }
 0x48f   : > { %2358 = vst [vmem:[%s4100_s21 + $0xc8] sm:$0xff] %v2294_v41 }
 0x491   : > { %v3148_v0 = vpop.f32.mrb[92].mxu1 }
 0x492   : > { %v2299_v44 = vadd.f32 %v3352_v43, %v3148_v0  ;;  %v2060_v5 = vpop.f32.mrb[93].mxu1  ;;  %v3373_v0 = vld [vmem:[%s3850_s12 + $0x180] sm:$0xff] }
 0x493   : > { %v2297_v47 = vadd.f32 %v3353_v45, %v2060_v5  ;;  %v3149_v8 = vpop.f32.mrb[94].mxu1  ;;  %v3374_v5 = vld [vmem:[%s3850_s12 + $0x198] sm:$0xff] }
 0x494   : > { %2363 = vst [vmem:[%s4100_s21 + $0xf0] sm:$0xff] %v2299_v44  ;;  %v2300_v50 = vadd.f32 %v3354_v49, %v3149_v8  ;;  %v2063_v13 = vpop.f32.mrb[95].mxu1  ;;  %v3375_v8 = vld [vmem:[%s3850_s12 + $0x188] sm:$0xff] }
 0x495   : > { %2361 = vst [vmem:[%s4100_s21 + $0xe0] sm:$0xff] %v2297_v47  ;;  %v2298_v54 = vadd.f32 %v3355_v53, %v2063_v13  ;;  %v3376_v13 = vld [vmem:[%s3850_s12 + $0x1b0] sm:$0xff] }
 0x496   : > { %2364 = vst [vmem:[%s4100_s21 + $0xf8] sm:$0xff] %v2300_v50 }
 0x497   : > { %2362 = vst [vmem:[%s4100_s21 + $0xe8] sm:$0xff] %v2298_v54 }
 0x499   : > { %v3168_v16 = vpop.f32.mrb[96].mxu1 }
 0x49a   : > { %v2303_v57 = vadd.f32 %v3356_v55, %v3168_v16  ;;  %v2109_v21 = vpop.f32.mrb[97].mxu1  ;;  %v3377_v16 = vld [vmem:[%s3850_s12 + $0x1a0] sm:$0xff] }
 0x49b   : > { %v2301_v60 = vadd.f32 %v3357_v59, %v2109_v21  ;;  %v3169_v24 = vpop.f32.mrb[98].mxu1  ;;  %v3378_v21 = vld [vmem:[%s3850_s12 + $0x1b8] sm:$0xff] }
 0x49c   : > { %2367 = vst [vmem:[%s4100_s21 + $0x110] sm:$0xff] %v2303_v57  ;;  %v2304_v63 = vadd.f32 %v3358_v56, %v3169_v24  ;;  %v2112_v29 = vpop.f32.mrb[99].mxu1  ;;  %v3379_v24 = vld [vmem:[%s3850_s12 + $0x1a8] sm:$0xff] }
 0x49d   : > { %2365 = vst [vmem:[%s4100_s21 + $0x100] sm:$0xff] %v2301_v60  ;;  %v2302_v2 = vadd.f32 %v3359_v1, %v2112_v29  ;;  %v3380_v29 = vld [vmem:[%s3850_s12 + $0x1d0] sm:$0xff] }
 0x49e   : > { %2368 = vst [vmem:[%s4100_s21 + $0x118] sm:$0xff] %v2304_v63 }
 0x49f   : > { %2366 = vst [vmem:[%s4100_s21 + $0x108] sm:$0xff] %v2302_v2 }
 0x4a1   : > { %v3172_v33 = vpop.f32.mrb[100].mxu1 }
 0x4a2   : > { %v2307_v6 = vadd.f32 %v3360_v3, %v3172_v33  ;;  %v2125_v39 = vpop.f32.mrb[101].mxu1  ;;  %v3381_v33 = vld [vmem:[%s3850_s12 + $0x1c0] sm:$0xff] }
 0x4a3   : > { %v2305_v10 = vadd.f32 %v3361_v7, %v2125_v39  ;;  %v3173_v42 = vpop.f32.mrb[102].mxu1  ;;  %v3382_v39 = vld [vmem:[%s3850_s12 + $0x1d8] sm:$0xff] }
 0x4a4   : > { %2371 = vst [vmem:[%s4100_s21 + $0x130] sm:$0xff] %v2307_v6  ;;  %v2308_v12 = vadd.f32 %v3362_v11, %v3173_v42  ;;  %v2128_v48 = vpop.f32.mrb[103].mxu1  ;;  %v3383_v42 = vld [vmem:[%s3850_s12 + $0x1c8] sm:$0xff] }
 0x4a5   : > { %2369 = vst [vmem:[%s4100_s21 + $0x120] sm:$0xff] %v2305_v10  ;;  %v2306_v32 = vadd.f32 %v3363_v14, %v2128_v48  ;;  %v3384_v48 = vld [vmem:[%s3850_s12 + $0x1f0] sm:$0xff] }
 0x4a6   : > { %2372 = vst [vmem:[%s4100_s21 + $0x138] sm:$0xff] %v2308_v12 }
 0x4a7   : > { %2370 = vst [vmem:[%s4100_s21 + $0x128] sm:$0xff] %v2306_v32 }
 0x4a9   : > { %v3176_v52 = vpop.f32.mrb[104].mxu1 }
 0x4aa   : > { %v2311_v18 = vadd.f32 %v3364_v17, %v3176_v52  ;;  %v2141_v58 = vpop.f32.mrb[105].mxu1  ;;  %v3385_v52 = vld [vmem:[%s3850_s12 + $0x1e0] sm:$0xff] }
 0x4ab   : > { %v2309_v20 = vadd.f32 %v3365_v37, %v2141_v58  ;;  %v3177_v62 = vpop.f32.mrb[106].mxu1  ;;  %v3386_v58 = vld [vmem:[%s3850_s12 + $0x1f8] sm:$0xff] }
 0x4ac   : > { %2375 = vst [vmem:[%s4100_s21 + $0x150] sm:$0xff] %v2311_v18  ;;  %v2312_v4 = vadd.f32 %v3366_v31, %v3177_v62  ;;  %v2144_v9 = vpop.f32.mrb[107].mxu1  ;;  %v3387_v62 = vld [vmem:[%s3850_s12 + $0x1e8] sm:$0xff] }
 0x4ad   : > { %2373 = vst [vmem:[%s4100_s21 + $0x140] sm:$0xff] %v2309_v20  ;;  %v2310_v19 = vadd.f32 %v3367_v15, %v2144_v9 }
 0x4ae   : > { %2376 = vst [vmem:[%s4100_s21 + $0x158] sm:$0xff] %v2312_v4 }
 0x4af   : > { %2374 = vst [vmem:[%s4100_s21 + $0x148] sm:$0xff] %v2310_v19 }
 0x4b1   : > { %v3180_v22 = vpop.f32.mrb[108].mxu1 }
 0x4b2   : > { %v2315_v23 = vadd.f32 %v3368_v46, %v3180_v22  ;;  %v2157_v25 = vpop.f32.mrb[109].mxu1 }
 0x4b3   : > { %v2313_v27 = vadd.f32 %v3369_v26, %v2157_v25  ;;  %v3181_v28 = vpop.f32.mrb[110].mxu1 }
 0x4b4   : > { %2379 = vst [vmem:[%s4100_s21 + $0x170] sm:$0xff] %v2315_v23  ;;  %v2316_v34 = vadd.f32 %v3370_v30, %v3181_v28  ;;  %v2160_v35 = vpop.f32.mrb[111].mxu1 }
 0x4b5   : > { %2377 = vst [vmem:[%s4100_s21 + $0x160] sm:$0xff] %v2313_v27  ;;  %v2314_v36 = vadd.f32 %v3371_v51, %v2160_v35 }
 0x4b6   : > { %2380 = vst [vmem:[%s4100_s21 + $0x178] sm:$0xff] %v2316_v34 }
 0x4b7   : > { %2378 = vst [vmem:[%s4100_s21 + $0x168] sm:$0xff] %v2314_v36 }
 0x4b9   : > { %v3200_v38 = vpop.f32.mrb[112].mxu1 }
 0x4ba   : > { %v2319_v40 = vadd.f32 %v3372_v61, %v3200_v38  ;;  %v2206_v41 = vpop.f32.mrb[113].mxu1 }
 0x4bb   : > { %v2317_v43 = vadd.f32 %v3373_v0, %v2206_v41  ;;  %v3201_v44 = vpop.f32.mrb[114].mxu1 }
 0x4bc   : > { %2383 = vst [vmem:[%s4100_s21 + $0x190] sm:$0xff] %v2319_v40  ;;  %v2320_v45 = vadd.f32 %v3374_v5, %v3201_v44  ;;  %v2209_v47 = vpop.f32.mrb[115].mxu1 }
 0x4bd   : > { %2381 = vst [vmem:[%s4100_s21 + $0x180] sm:$0xff] %v2317_v43  ;;  %v2318_v49 = vadd.f32 %v3375_v8, %v2209_v47 }
 0x4be   : > { %2384 = vst [vmem:[%s4100_s21 + $0x198] sm:$0xff] %v2320_v45 }
 0x4bf   : > { %2382 = vst [vmem:[%s4100_s21 + $0x188] sm:$0xff] %v2318_v49 }
 0x4c1   : > { %v3204_v50 = vpop.f32.mrb[116].mxu1 }
 0x4c2   : > { %v2323_v53 = vadd.f32 %v3376_v13, %v3204_v50  ;;  %v2222_v54 = vpop.f32.mrb[117].mxu1 }
 0x4c3   : > { %v2321_v55 = vadd.f32 %v3377_v16, %v2222_v54  ;;  %v3205_v57 = vpop.f32.mrb[118].mxu1 }
 0x4c4   : > { %2387 = vst [vmem:[%s4100_s21 + $0x1b0] sm:$0xff] %v2323_v53  ;;  %v2324_v59 = vadd.f32 %v3378_v21, %v3205_v57  ;;  %v2225_v60 = vpop.f32.mrb[119].mxu1 }
 0x4c5   : > { %2385 = vst [vmem:[%s4100_s21 + $0x1a0] sm:$0xff] %v2321_v55  ;;  %v2322_v56 = vadd.f32 %v3379_v24, %v2225_v60 }
 0x4c6   : > { %2388 = vst [vmem:[%s4100_s21 + $0x1b8] sm:$0xff] %v2324_v59 }
 0x4c7   : > { %2386 = vst [vmem:[%s4100_s21 + $0x1a8] sm:$0xff] %v2322_v56 }
 0x4c9   : > { %v3208_v63 = vpop.f32.mrb[120].mxu1 }
 0x4ca   : > { %v2327_v1 = vadd.f32 %v3380_v29, %v3208_v63  ;;  %v2238_v2 = vpop.f32.mrb[121].mxu1 }
 0x4cb   : > { %v2325_v3 = vadd.f32 %v3381_v33, %v2238_v2  ;;  %v3209_v6 = vpop.f32.mrb[122].mxu1 }
 0x4cc   : > { %2391 = vst [vmem:[%s4100_s21 + $0x1d0] sm:$0xff] %v2327_v1  ;;  %v2328_v7 = vadd.f32 %v3382_v39, %v3209_v6  ;;  %v2241_v10 = vpop.f32.mrb[123].mxu1 }
 0x4cd   : > { %2389 = vst [vmem:[%s4100_s21 + $0x1c0] sm:$0xff] %v2325_v3  ;;  %v2326_v11 = vadd.f32 %v3383_v42, %v2241_v10 }
 0x4ce   : > { %2392 = vst [vmem:[%s4100_s21 + $0x1d8] sm:$0xff] %v2328_v7 }
 0x4cf   : > { %2390 = vst [vmem:[%s4100_s21 + $0x1c8] sm:$0xff] %v2326_v11 }
 0x4d1   : > { %v3212_v12 = vpop.f32.mrb[124].mxu1 }
 0x4d2   : > { %v2331_v14 = vadd.f32 %v3384_v48, %v3212_v12  ;;  %v2254_v32 = vpop.f32.mrb[125].mxu1 }
 0x4d3   : > { %v2329_v17 = vadd.f32 %v3385_v52, %v2254_v32  ;;  %v3213_v18 = vpop.f32.mrb[126].mxu1 }
 0x4d4   : > { %2395 = vst [vmem:[%s4100_s21 + $0x1f0] sm:$0xff] %v2331_v14  ;;  %v2332_v37 = vadd.f32 %v3386_v58, %v3213_v18  ;;  %v2257_v20 = vpop.f32.mrb[127].mxu1 }
 0x4d5   : > { %2393 = vst [vmem:[%s4100_s21 + $0x1e0] sm:$0xff] %v2329_v17  ;;  %v2330_v31 = vadd.f32 %v3387_v62, %v2257_v20 }
 0x4d6   : > { %2396 = vst [vmem:[%s4100_s21 + $0x1f8] sm:$0xff] %v2332_v37 }
 0x4d7   : > { %2394 = vst [vmem:[%s4100_s21 + $0x1e8] sm:$0xff] %v2330_v31 }
 0x4d8   : > { %3517 = shalt.err (!%p3514_p7)
}
 0x4d9   : > { %s3518_s7 = scalar_lea.hbm %s4229_s8, 8192  ;;  %s3522_s12 = scalar_lea.hbm %s4283_s4, 16384 }
 0x4da   : > { %p3519_p9 = scmp.ne.s32.totalorder %s4229_s8, %s3518_s7  ;;  %p3523_p11 = scmp.lt.u32.totalorder %s4229_s8, %s4283_s4 }
 0x4db   : > { %p3524_p2 = scmp.lt.u32.totalorder %s3522_s12, %s3518_s7  ;;  %p3526_p1 = scmp.lt.u32.totalorder %s3518_s7, %s4229_s8 }
 0x4dc   : > { %p3520_p0 = pnand %p3519_p9, %p4304_p13 }
 0x4dd   : > { %p3525_p12 = por %p3524_p2, %p3523_p11 }
 0x4de   : > { %p3521_p8 = pneg %p3520_p0 }
 0x4df   : > { %p3527_p6 = por %p3526_p1, %p3525_p12 }
 0x4e1   : > { %p3528_p10 = pnand %p3527_p6, %p3521_p8 }
 0x4e3   : > { %3531 = shalt.err (!%p3528_p10)
}
 0x4e4   : > { %s3593_s25 = smov 128   ;;  %s3594_s5 = smov 8  }
 0x4e5   : > { %3226 = dma.vmem_to_hbm [thread:$0]  (%p4304_p13), %s4231_s20, 8192, %s4229_s8, %s2398_s19, %s3593_s25, %s3593_s25, %s3594_s5  }
 0x4e6 PF: > { %s2427_s21 = sand.u32 1, %s3570_s15   ;;  %p4305_p4 = scmp.ne.s32.totalorder %s4290_s22, 0 }
 0x4e7   : > { %p4306_p5 = scmp.ge.s32.totalorder %s3582_s18, 2  ;;  %s2428_s24 = scalar_lea.sflag [#allocation4], %s2427_s21 }
 0x4e9   : > { %p3243_p3 = pnand %p4306_p5, %p4305_p4 }
 0x4eb   : > { %3565 = dma.done.wait (!%p3243_p3), %s2428_s24, 8192  }
 0x4ec   : > { %3567 = vsyncadd (!%p3243_p3), %s2428_s24, 4294959104  ;;  %p21_p7 = scmp.ge.s32.totalorder %s3736_s26, 4   ;;  %s4307_s15 = smov %s3574_s16 }
 0x4ed   : > { %s4308_s16 = smov %s3578_s17  ;;  %s4309_s17 = smov %s3752_s14 }
 0x4ee   : > { %s4310_s18 = smov %s3736_s26  ;;  %23 = sbr.rel (!%p21_p7) target bundleno = 11 (0xb), region = 102 }
 0x4f5   :  { %2433 = vsyncpa [#allocation3], 1 }
 0x4f6   :  { %2435 = vsyncpa [#allocation3 + $0x1], 1 }
 0x4f7   :  { %2436 = vsyncpa [#allocation6], 1 }
 0x4f8   :  { %2438 = vsyncpa [#allocation6 + $0x1], 1 }
 0x4f9   :  { %2439 = vsyncpa [#allocation9], 1 }
 0x4fa   :  { %2440 = vsyncpa [#allocation4], 1 }
 0x4fb   :  { %2442 = vsyncpa [#allocation4 + $0x1], 1 }

</bundles_post_ra>
